<compile_context>
chip_gen: v7x
topology: tpu7x:2x2x1
jax: 0.10.0
libtpu: 0.0.40
codegen_flags: <defaults>
</compile_context>

<pallas_src>
import jax
import jax.numpy as jnp
import numpy as np
from jax.experimental import pallas as pl
from jax.experimental.pallas import tpu as pltpu

NUM_ITER = 3  # routing iterations (matches the PyTorch module)


def digitcaps_kernel(x_ref, w_ref, fcw_ref, fcb_ref, v_ref, pred_ref):
    """Single invocation, both capsules.

      x_ref   : (I, B, R)    bf16  activations (VMEM)
      w_ref   : (C, I, O, R) bf16  transformation matrices (VMEM)
      fcw_ref : (C, 1, O)    f32   fc weight, split per capsule (VMEM)
      fcb_ref : (1,)         f32   fc bias (SMEM scalar)
      v_ref   : (B, C*O)     f32   capsule outputs, torch v_j.view order
      pred_ref: (B, 1)       f32   sigmoid(fc(v)) prediction
    """
    I = x_ref.shape[0]
    C = w_ref.shape[0]
    O = w_ref.shape[2]

    x = x_ref[...]  # (I, B, R) bf16, shared by both capsules

    v_caps = []
    logit = None
    # Static unroll over the C=2 capsules: both dependency chains live in one
    # kernel invocation and interleave (no grid-step overhead, no fork/join).
    for c in range(C):
        # u_hat[i,b,o] = sum_r x[i,b,r] * W[c,i,o,r]
        # One batched MXU dot per capsule, bf16 inputs, f32 accumulation.
        u = jax.lax.dot_general(
            x, w_ref[c],
            dimension_numbers=(((2,), (2,)), ((0,), (0,))),
            preferred_element_type=jnp.float32)                  # (I, B, O)

        # ---- dynamic routing (3 iterations), all f32 ----------------------
        b_log = None            # routing logits (I, 1); softmax over I
        v = None
        for it in range(NUM_ITER):
            last = it == NUM_ITER - 1
            if it == 0:
                # b_ij == 0  =>  softmax == 1/I exactly: skip max/exp/sum/div.
                s = jnp.sum(u, axis=0) * (1.0 / I)               # (B, O)
            else:
                m = jnp.max(b_log, axis=0, keepdims=True)
                e = jnp.exp(b_log - m)
                denom = jnp.sum(e, axis=0, keepdims=True)
                # Approx EUP reciprocal only on the output path (last iter);
                # feedback path keeps exact divides so b_ij stays bit-stable.
                cw = e * pl.reciprocal(denom, approx=True) if last else e / denom
                s = jnp.sum(u * cw[:, :, None], axis=0)          # (B, O)

            sq = s * s
            # squash: last dim of s_j has size 1 in the torch code, so it is
            # elementwise: s^2*s/((1+s^2)*sqrt(s^2)) == s*|s|/(1+s^2) (NaN-free)
            if last:
                v = s * jnp.abs(s) * pl.reciprocal(1.0 + sq, approx=True)
            else:
                v = s * jnp.abs(s) / (1.0 + sq)
                a = jnp.sum(u * v[None, :, :], axis=2)           # (I, B)
                upd = jnp.mean(a, axis=1, keepdims=True)         # (I, 1)
                b_log = upd if it == 0 else b_log + upd

        v_caps.append(v)                                         # (B, O) f32
        # partial fc logit for this capsule: sum_o v[b,o] * fcw[c,o]
        part = jnp.sum(v * fcw_ref[c], axis=1, keepdims=True)    # (B, 1)
        logit = part if c == 0 else logit + part

    # v in torch v_j.view(B, C*O) order -> wrapper reshape is a free bitcast.
    v_ref[...] = jnp.concatenate(v_caps, axis=1)                 # (B, C*O)

    # fused epilogue: bias (SMEM scalar) + sigmoid
    z = logit + fcb_ref[0]                                       # (B, 1)
    pred_ref[...] = 1.0 / (1.0 + jnp.exp(-z))


def prepare_params(W, fc_w):
    """One-time weight prep (outside the per-call hot path).

    W    : (1, I, C, O, R) f32  -> (C, I, O, R) bf16  (R stays on lanes: dense)
    fc_w : (1, C*O)        f32  -> (C, 1, O)    f32   (torch v_j.view order)
    """
    _, I, C, O, R = W.shape
    w_prep = jnp.transpose(W[0], (1, 0, 2, 3)).astype(jnp.bfloat16)   # (C,I,O,R)
    fcw_prep = fc_w.reshape(C, 1, O).astype(jnp.float32)              # (C,1,O)
    return w_prep, fcw_prep


@jax.jit
def digitcaps_forward(x, w_prep, fcw_prep, fc_b):
    """x: (B, R, I) f32; w_prep: (C, I, O, R) bf16; fcw_prep: (C, 1, O) f32;
    fc_b: (1,) f32.  Returns (pred (B,), v_j (B, C, O, 1))."""
    C, I, O, R = w_prep.shape
    B = x.shape[0]

    # Activation re-layout for the MXU: (B,R,I) -> (I,B,R) in bf16.
    # allow_input_fusion lets XLA fuse this transpose+cast into the
    # pallas_call operand (no separate dispatch / HBM round trip when fused).
    x_t = jnp.transpose(x, (2, 0, 1)).astype(jnp.bfloat16)            # (I, B, R)
    fcb = fc_b.astype(jnp.float32)                                    # (1,)

    v_flat, pred = pl.pallas_call(
        digitcaps_kernel,
        out_shape=(
            jax.ShapeDtypeStruct((B, C * O), jnp.float32),
            jax.ShapeDtypeStruct((B, 1), jnp.float32),
        ),
        in_specs=[
            pl.BlockSpec(memory_space=pltpu.MemorySpace.VMEM),   # x_t
            pl.BlockSpec(memory_space=pltpu.MemorySpace.VMEM),   # W
            pl.BlockSpec(memory_space=pltpu.MemorySpace.VMEM),   # fc weight
            pl.BlockSpec(memory_space=pltpu.MemorySpace.SMEM),   # fc bias scalar
        ],
        out_specs=(
            pl.BlockSpec(memory_space=pltpu.MemorySpace.VMEM),   # v (B, C*O)
            pl.BlockSpec(memory_space=pltpu.MemorySpace.VMEM),   # pred (B, 1)
        ),
        compiler_params=pltpu.CompilerParams(
            # permit XLA to fuse the x transpose/cast producer into operand 0
            allow_input_fusion=[True, False, False, False]),
    )(x_t, w_prep, fcw_prep, fcb)

    # Only free bitcast-reshapes remain in the wrapper.
    v_j = v_flat.reshape(B, C, O, 1)
    return pred.reshape(B), v_j


def digitcaps_reference(x, W, fc_w, fc_b):
    """Pure-JAX mirror of the PyTorch forward.

    The u_hat contraction is evaluated with bf16 inputs / f32 accumulation to
    match the kernel's mixed-precision policy; everything downstream (routing,
    squash, fc, sigmoid) is f32, as in the kernel.
    """
    B = x.shape[0]
    _, I, C, O, R = W.shape
    u_hat = jnp.einsum('icor,bri->bico',
                       W[0].astype(jnp.bfloat16), x.astype(jnp.bfloat16),
                       preferred_element_type=jnp.float32)            # (B,I,C,O)
    b_log = jnp.zeros((I, C), jnp.float32)
    v = None
    for it in range(NUM_ITER):
        cw = jax.nn.softmax(b_log, axis=0)                            # (I, C)
        s = jnp.einsum('ic,bico->bco', cw, u_hat)                     # (B, C, O)
        # identical to s^2*s/((1+s^2)*sqrt(s^2)) for s != 0, NaN-free at s == 0
        v = s * jnp.abs(s) / (1.0 + s * s)
        if it < NUM_ITER - 1:
            a = jnp.einsum('bico,bco->bic', u_hat, v)                 # (B, I, C)
            b_log = b_log + jnp.mean(a, axis=0)
    logits = v.reshape(B, C * O) @ fc_w[0] + fc_b[0]
    pred = jax.nn.sigmoid(logits)
    return pred, v[..., None]


if __name__ == "__main__":
    # Module defaults: num_capsules=2, num_routes=1152, in_channels=8, out_channels=16
    B, R, I, C, O = 2, 1152, 8, 2, 16

    key = jax.random.PRNGKey(0)
    kx, kw, kfw, kfb = jax.random.split(key, 4)
    x = jax.random.normal(kx, (B, R, I), jnp.float32)
    W = jax.random.normal(kw, (1, I, C, O, R), jnp.float32)           # torch.randn
    bound = 1.0 / np.sqrt(C * O)                                      # nn.Linear init
    fc_w = jax.random.uniform(kfw, (1, C * O), jnp.float32, -bound, bound)
    fc_b = jax.random.uniform(kfb, (1,), jnp.float32, -bound, bound)

    # One-time weight prep (kernel layout + bf16), outside the per-call hot path.
    w_prep, fcw_prep = prepare_params(W, fc_w)

    pred, v_j = jax.block_until_ready(digitcaps_forward(x, w_prep, fcw_prep, fc_b))

    assert pred.shape == (B,)
    assert v_j.shape == (B, C, O, 1)

    pred_ref, v_ref = digitcaps_reference(x, W, fc_w, fc_b)
    np.testing.assert_allclose(np.asarray(v_j), np.asarray(v_ref),
                               rtol=5e-2, atol=5e-2)
    np.testing.assert_allclose(np.asarray(pred), np.asarray(pred_ref),
                               rtol=5e-2, atol=5e-2)

    print("KERNEL_OK")
</pallas_src>

<mosaic_0001>
module attributes {stable_mosaic.version = 11 : i64} {
  func.func @digitcaps_kernel(%arg0: memref<8x2x1152xbf16, #tpu.memory_space<vmem>>, %arg1: memref<2x8x16x1152xbf16, #tpu.memory_space<vmem>>, %arg2: memref<2x1x16xf32, #tpu.memory_space<vmem>>, %arg3: memref<1xf32, #tpu.memory_space<smem>>, %arg4: memref<2x32xf32, #tpu.memory_space<vmem>>, %arg5: memref<2x1xf32, #tpu.memory_space<vmem>>) attributes {dimension_semantics = [], scalar_prefetch = 0 : i64, scratch_operands = 0 : i64, tpu.core_type = #tpu.core_type<tc>} {
    %c0 = arith.constant 0 : index
    %c0_0 = arith.constant 0 : index
    %c0_1 = arith.constant 0 : index
    %0 = vector.load %arg0[%c0, %c0_0, %c0_1] : memref<8x2x1152xbf16, #tpu.memory_space<vmem>>, vector<8x2x1152xbf16>
    %c0_2 = arith.constant 0 : index
    %c0_3 = arith.constant 0 : index
    %c0_4 = arith.constant 0 : index
    %c0_5 = arith.constant 0 : index
    %1 = vector.load %arg1[%c0_2, %c0_3, %c0_4, %c0_5] : memref<2x8x16x1152xbf16, #tpu.memory_space<vmem>>, vector<1x8x16x1152xbf16>
    %2 = vector.shape_cast %1 : vector<1x8x16x1152xbf16> to vector<8x16x1152xbf16>
    %cst = arith.constant dense<0.000000e+00> : vector<8x2x16xf32>
    %3 = tpu.matmul %0, %2, %cst {dimension_numbers = #tpu.dot_dimension_numbers<[2], [2], [1], [1], [0, 0, 0, 1, 1, 1], [0], [0]>} : vector<8x2x1152xbf16>, vector<8x16x1152xbf16>, vector<8x2x16xf32> -> vector<8x2x16xf32>
    %cst_6 = arith.constant dense<0.000000e+00> : vector<2x16xf32>
    %4 = vector.multi_reduction <add>, %3, %cst_6 [0] : vector<8x2x16xf32> to vector<2x16xf32>
    %cst_7 = arith.constant 1.250000e-01 : f32
    %5 = vector.broadcast %cst_7 : f32 to vector<2x16xf32>
    %6 = arith.mulf %4, %5 : vector<2x16xf32>
    %7 = arith.mulf %6, %6 : vector<2x16xf32>
    %8 = math.absf %6 : vector<2x16xf32>
    %9 = arith.mulf %6, %8 : vector<2x16xf32>
    %cst_8 = arith.constant 1.000000e+00 : f32
    %10 = vector.broadcast %cst_8 : f32 to vector<2x16xf32>
    %11 = arith.addf %10, %7 : vector<2x16xf32>
    %12 = arith.divf %9, %11 : vector<2x16xf32>
    %13 = vector.shape_cast %12 : vector<2x16xf32> to vector<1x2x16xf32>
    %14 = vector.broadcast %13 : vector<1x2x16xf32> to vector<8x2x16xf32>
    %15 = arith.mulf %3, %14 : vector<8x2x16xf32>
    %cst_9 = arith.constant dense<0.000000e+00> : vector<8x2xf32>
    %16 = vector.multi_reduction <add>, %15, %cst_9 [2] : vector<8x2x16xf32> to vector<8x2xf32>
    %cst_10 = arith.constant dense<0.000000e+00> : vector<8xf32>
    %17 = vector.multi_reduction <add>, %16, %cst_10 [1] : vector<8x2xf32> to vector<8xf32>
    %18 = vector.shape_cast %17 : vector<8xf32> to vector<8x1xf32>
    %cst_11 = arith.constant 2.000000e+00 : f32
    %19 = vector.broadcast %cst_11 : f32 to vector<8x1xf32>
    %20 = arith.divf %18, %19 : vector<8x1xf32>
    %cst_12 = arith.constant dense<0xFF800000> : vector<1xf32>
    %21 = vector.multi_reduction <maximumf>, %20, %cst_12 [0] : vector<8x1xf32> to vector<1xf32>
    %22 = vector.shape_cast %21 : vector<1xf32> to vector<1x1xf32>
    %23 = vector.broadcast %22 : vector<1x1xf32> to vector<8x1xf32>
    %24 = arith.subf %20, %23 : vector<8x1xf32>
    %25 = math.exp %24 : vector<8x1xf32>
    %cst_13 = arith.constant dense<0.000000e+00> : vector<1xf32>
    %26 = vector.multi_reduction <add>, %25, %cst_13 [0] : vector<8x1xf32> to vector<1xf32>
    %27 = vector.shape_cast %26 : vector<1xf32> to vector<1x1xf32>
    %28 = vector.broadcast %27 : vector<1x1xf32> to vector<8x1xf32>
    %29 = arith.divf %25, %28 : vector<8x1xf32>
    %30 = vector.shape_cast %29 : vector<8x1xf32> to vector<8x1x1xf32>
    %31 = vector.broadcast %30 : vector<8x1x1xf32> to vector<8x2x16xf32>
    %32 = arith.mulf %3, %31 : vector<8x2x16xf32>
    %cst_14 = arith.constant dense<0.000000e+00> : vector<2x16xf32>
    %33 = vector.multi_reduction <add>, %32, %cst_14 [0] : vector<8x2x16xf32> to vector<2x16xf32>
    %34 = arith.mulf %33, %33 : vector<2x16xf32>
    %35 = math.absf %33 : vector<2x16xf32>
    %36 = arith.mulf %33, %35 : vector<2x16xf32>
    %cst_15 = arith.constant 1.000000e+00 : f32
    %37 = vector.broadcast %cst_15 : f32 to vector<2x16xf32>
    %38 = arith.addf %37, %34 : vector<2x16xf32>
    %39 = arith.divf %36, %38 : vector<2x16xf32>
    %40 = vector.shape_cast %39 : vector<2x16xf32> to vector<1x2x16xf32>
    %41 = vector.broadcast %40 : vector<1x2x16xf32> to vector<8x2x16xf32>
    %42 = arith.mulf %3, %41 : vector<8x2x16xf32>
    %cst_16 = arith.constant dense<0.000000e+00> : vector<8x2xf32>
    %43 = vector.multi_reduction <add>, %42, %cst_16 [2] : vector<8x2x16xf32> to vector<8x2xf32>
    %cst_17 = arith.constant dense<0.000000e+00> : vector<8xf32>
    %44 = vector.multi_reduction <add>, %43, %cst_17 [1] : vector<8x2xf32> to vector<8xf32>
    %45 = vector.shape_cast %44 : vector<8xf32> to vector<8x1xf32>
    %cst_18 = arith.constant 2.000000e+00 : f32
    %46 = vector.broadcast %cst_18 : f32 to vector<8x1xf32>
    %47 = arith.divf %45, %46 : vector<8x1xf32>
    %48 = arith.addf %20, %47 : vector<8x1xf32>
    %cst_19 = arith.constant dense<0xFF800000> : vector<1xf32>
    %49 = vector.multi_reduction <maximumf>, %48, %cst_19 [0] : vector<8x1xf32> to vector<1xf32>
    %50 = vector.shape_cast %49 : vector<1xf32> to vector<1x1xf32>
    %51 = vector.broadcast %50 : vector<1x1xf32> to vector<8x1xf32>
    %52 = arith.subf %48, %51 : vector<8x1xf32>
    %53 = math.exp %52 : vector<8x1xf32>
    %cst_20 = arith.constant dense<0.000000e+00> : vector<1xf32>
    %54 = vector.multi_reduction <add>, %53, %cst_20 [0] : vector<8x1xf32> to vector<1xf32>
    %55 = vector.shape_cast %54 : vector<1xf32> to vector<1x1xf32>
    %56 = tpu.reciprocal %55 {approx = true} : vector<1x1xf32> -> vector<1x1xf32>
    %57 = vector.broadcast %56 : vector<1x1xf32> to vector<8x1xf32>
    %58 = arith.mulf %53, %57 : vector<8x1xf32>
    %59 = vector.shape_cast %58 : vector<8x1xf32> to vector<8x1x1xf32>
    %60 = vector.broadcast %59 : vector<8x1x1xf32> to vector<8x2x16xf32>
    %61 = arith.mulf %3, %60 : vector<8x2x16xf32>
    %cst_21 = arith.constant dense<0.000000e+00> : vector<2x16xf32>
    %62 = vector.multi_reduction <add>, %61, %cst_21 [0] : vector<8x2x16xf32> to vector<2x16xf32>
    %63 = arith.mulf %62, %62 : vector<2x16xf32>
    %64 = math.absf %62 : vector<2x16xf32>
    %65 = arith.mulf %62, %64 : vector<2x16xf32>
    %cst_22 = arith.constant 1.000000e+00 : f32
    %66 = vector.broadcast %cst_22 : f32 to vector<2x16xf32>
    %67 = arith.addf %66, %63 : vector<2x16xf32>
    %68 = tpu.reciprocal %67 {approx = true} : vector<2x16xf32> -> vector<2x16xf32>
    %69 = arith.mulf %65, %68 : vector<2x16xf32>
    %c0_23 = arith.constant 0 : index
    %c0_24 = arith.constant 0 : index
    %c0_25 = arith.constant 0 : index
    %70 = vector.load %arg2[%c0_23, %c0_24, %c0_25] : memref<2x1x16xf32, #tpu.memory_space<vmem>>, vector<1x1x16xf32>
    %71 = vector.shape_cast %70 : vector<1x1x16xf32> to vector<1x16xf32>
    %72 = vector.broadcast %71 : vector<1x16xf32> to vector<2x16xf32>
    %73 = arith.mulf %69, %72 : vector<2x16xf32>
    %cst_26 = arith.constant dense<0.000000e+00> : vector<2xf32>
    %74 = vector.multi_reduction <add>, %73, %cst_26 [1] : vector<2x16xf32> to vector<2xf32>
    %75 = vector.shape_cast %74 : vector<2xf32> to vector<2x1xf32>
    %c1 = arith.constant 1 : index
    %c0_27 = arith.constant 0 : index
    %c0_28 = arith.constant 0 : index
    %c0_29 = arith.constant 0 : index
    %76 = vector.load %arg1[%c1, %c0_27, %c0_28, %c0_29] : memref<2x8x16x1152xbf16, #tpu.memory_space<vmem>>, vector<1x8x16x1152xbf16>
    %77 = vector.shape_cast %76 : vector<1x8x16x1152xbf16> to vector<8x16x1152xbf16>
    %cst_30 = arith.constant dense<0.000000e+00> : vector<8x2x16xf32>
    %78 = tpu.matmul %0, %77, %cst_30 {dimension_numbers = #tpu.dot_dimension_numbers<[2], [2], [1], [1], [0, 0, 0, 1, 1, 1], [0], [0]>} : vector<8x2x1152xbf16>, vector<8x16x1152xbf16>, vector<8x2x16xf32> -> vector<8x2x16xf32>
    %cst_31 = arith.constant dense<0.000000e+00> : vector<2x16xf32>
    %79 = vector.multi_reduction <add>, %78, %cst_31 [0] : vector<8x2x16xf32> to vector<2x16xf32>
    %cst_32 = arith.constant 1.250000e-01 : f32
    %80 = vector.broadcast %cst_32 : f32 to vector<2x16xf32>
    %81 = arith.mulf %79, %80 : vector<2x16xf32>
    %82 = arith.mulf %81, %81 : vector<2x16xf32>
    %83 = math.absf %81 : vector<2x16xf32>
    %84 = arith.mulf %81, %83 : vector<2x16xf32>
    %cst_33 = arith.constant 1.000000e+00 : f32
    %85 = vector.broadcast %cst_33 : f32 to vector<2x16xf32>
    %86 = arith.addf %85, %82 : vector<2x16xf32>
    %87 = arith.divf %84, %86 : vector<2x16xf32>
    %88 = vector.shape_cast %87 : vector<2x16xf32> to vector<1x2x16xf32>
    %89 = vector.broadcast %88 : vector<1x2x16xf32> to vector<8x2x16xf32>
    %90 = arith.mulf %78, %89 : vector<8x2x16xf32>
    %cst_34 = arith.constant dense<0.000000e+00> : vector<8x2xf32>
    %91 = vector.multi_reduction <add>, %90, %cst_34 [2] : vector<8x2x16xf32> to vector<8x2xf32>
    %cst_35 = arith.constant dense<0.000000e+00> : vector<8xf32>
    %92 = vector.multi_reduction <add>, %91, %cst_35 [1] : vector<8x2xf32> to vector<8xf32>
    %93 = vector.shape_cast %92 : vector<8xf32> to vector<8x1xf32>
    %cst_36 = arith.constant 2.000000e+00 : f32
    %94 = vector.broadcast %cst_36 : f32 to vector<8x1xf32>
    %95 = arith.divf %93, %94 : vector<8x1xf32>
    %cst_37 = arith.constant dense<0xFF800000> : vector<1xf32>
    %96 = vector.multi_reduction <maximumf>, %95, %cst_37 [0] : vector<8x1xf32> to vector<1xf32>
    %97 = vector.shape_cast %96 : vector<1xf32> to vector<1x1xf32>
    %98 = vector.broadcast %97 : vector<1x1xf32> to vector<8x1xf32>
    %99 = arith.subf %95, %98 : vector<8x1xf32>
    %100 = math.exp %99 : vector<8x1xf32>
    %cst_38 = arith.constant dense<0.000000e+00> : vector<1xf32>
    %101 = vector.multi_reduction <add>, %100, %cst_38 [0] : vector<8x1xf32> to vector<1xf32>
    %102 = vector.shape_cast %101 : vector<1xf32> to vector<1x1xf32>
    %103 = vector.broadcast %102 : vector<1x1xf32> to vector<8x1xf32>
    %104 = arith.divf %100, %103 : vector<8x1xf32>
    %105 = vector.shape_cast %104 : vector<8x1xf32> to vector<8x1x1xf32>
    %106 = vector.broadcast %105 : vector<8x1x1xf32> to vector<8x2x16xf32>
    %107 = arith.mulf %78, %106 : vector<8x2x16xf32>
    %cst_39 = arith.constant dense<0.000000e+00> : vector<2x16xf32>
    %108 = vector.multi_reduction <add>, %107, %cst_39 [0] : vector<8x2x16xf32> to vector<2x16xf32>
    %109 = arith.mulf %108, %108 : vector<2x16xf32>
    %110 = math.absf %108 : vector<2x16xf32>
    %111 = arith.mulf %108, %110 : vector<2x16xf32>
    %cst_40 = arith.constant 1.000000e+00 : f32
    %112 = vector.broadcast %cst_40 : f32 to vector<2x16xf32>
    %113 = arith.addf %112, %109 : vector<2x16xf32>
    %114 = arith.divf %111, %113 : vector<2x16xf32>
    %115 = vector.shape_cast %114 : vector<2x16xf32> to vector<1x2x16xf32>
    %116 = vector.broadcast %115 : vector<1x2x16xf32> to vector<8x2x16xf32>
    %117 = arith.mulf %78, %116 : vector<8x2x16xf32>
    %cst_41 = arith.constant dense<0.000000e+00> : vector<8x2xf32>
    %118 = vector.multi_reduction <add>, %117, %cst_41 [2] : vector<8x2x16xf32> to vector<8x2xf32>
    %cst_42 = arith.constant dense<0.000000e+00> : vector<8xf32>
    %119 = vector.multi_reduction <add>, %118, %cst_42 [1] : vector<8x2xf32> to vector<8xf32>
    %120 = vector.shape_cast %119 : vector<8xf32> to vector<8x1xf32>
    %cst_43 = arith.constant 2.000000e+00 : f32
    %121 = vector.broadcast %cst_43 : f32 to vector<8x1xf32>
    %122 = arith.divf %120, %121 : vector<8x1xf32>
    %123 = arith.addf %95, %122 : vector<8x1xf32>
    %cst_44 = arith.constant dense<0xFF800000> : vector<1xf32>
    %124 = vector.multi_reduction <maximumf>, %123, %cst_44 [0] : vector<8x1xf32> to vector<1xf32>
    %125 = vector.shape_cast %124 : vector<1xf32> to vector<1x1xf32>
    %126 = vector.broadcast %125 : vector<1x1xf32> to vector<8x1xf32>
    %127 = arith.subf %123, %126 : vector<8x1xf32>
    %128 = math.exp %127 : vector<8x1xf32>
    %cst_45 = arith.constant dense<0.000000e+00> : vector<1xf32>
    %129 = vector.multi_reduction <add>, %128, %cst_45 [0] : vector<8x1xf32> to vector<1xf32>
    %130 = vector.shape_cast %129 : vector<1xf32> to vector<1x1xf32>
    %131 = tpu.reciprocal %130 {approx = true} : vector<1x1xf32> -> vector<1x1xf32>
    %132 = vector.broadcast %131 : vector<1x1xf32> to vector<8x1xf32>
    %133 = arith.mulf %128, %132 : vector<8x1xf32>
    %134 = vector.shape_cast %133 : vector<8x1xf32> to vector<8x1x1xf32>
    %135 = vector.broadcast %134 : vector<8x1x1xf32> to vector<8x2x16xf32>
    %136 = arith.mulf %78, %135 : vector<8x2x16xf32>
    %cst_46 = arith.constant dense<0.000000e+00> : vector<2x16xf32>
    %137 = vector.multi_reduction <add>, %136, %cst_46 [0] : vector<8x2x16xf32> to vector<2x16xf32>
    %138 = arith.mulf %137, %137 : vector<2x16xf32>
    %139 = math.absf %137 : vector<2x16xf32>
    %140 = arith.mulf %137, %139 : vector<2x16xf32>
    %cst_47 = arith.constant 1.000000e+00 : f32
    %141 = vector.broadcast %cst_47 : f32 to vector<2x16xf32>
    %142 = arith.addf %141, %138 : vector<2x16xf32>
    %143 = tpu.reciprocal %142 {approx = true} : vector<2x16xf32> -> vector<2x16xf32>
    %144 = arith.mulf %140, %143 : vector<2x16xf32>
    %c1_48 = arith.constant 1 : index
    %c0_49 = arith.constant 0 : index
    %c0_50 = arith.constant 0 : index
    %145 = vector.load %arg2[%c1_48, %c0_49, %c0_50] : memref<2x1x16xf32, #tpu.memory_space<vmem>>, vector<1x1x16xf32>
    %146 = vector.shape_cast %145 : vector<1x1x16xf32> to vector<1x16xf32>
    %147 = vector.broadcast %146 : vector<1x16xf32> to vector<2x16xf32>
    %148 = arith.mulf %144, %147 : vector<2x16xf32>
    %cst_51 = arith.constant dense<0.000000e+00> : vector<2xf32>
    %149 = vector.multi_reduction <add>, %148, %cst_51 [1] : vector<2x16xf32> to vector<2xf32>
    %150 = vector.shape_cast %149 : vector<2xf32> to vector<2x1xf32>
    %151 = arith.addf %75, %150 : vector<2x1xf32>
    %152 = tpu.concatenate %69, %144 in 1 : vector<2x16xf32>, vector<2x16xf32> -> vector<2x32xf32>
    %c0_52 = arith.constant 0 : index
    %c0_53 = arith.constant 0 : index
    %153 = vector.load %arg4[%c0_52, %c0_53] : memref<2x32xf32, #tpu.memory_space<vmem>>, vector<2x32xf32>
    tpu.vector_store %arg4[%c0_52, %c0_53], %152 {strides = array<i32>} : memref<2x32xf32, #tpu.memory_space<vmem>>, vector<2x32xf32>,
    %c0_54 = arith.constant 0 : index
    %154 = memref.load %arg3[%c0_54] : memref<1xf32, #tpu.memory_space<smem>>
    %155 = vector.broadcast %154 : f32 to vector<2x1xf32>
    %156 = arith.addf %151, %155 : vector<2x1xf32>
    %cst_55 = arith.constant 0.000000e+00 : f32
    %157 = vector.broadcast %cst_55 : f32 to vector<2x1xf32>
    %158 = arith.subf %157, %156 : vector<2x1xf32>
    %159 = math.exp %158 : vector<2x1xf32>
    %cst_56 = arith.constant 1.000000e+00 : f32
    %160 = vector.broadcast %cst_56 : f32 to vector<2x1xf32>
    %161 = arith.addf %160, %159 : vector<2x1xf32>
    %cst_57 = arith.constant 1.000000e+00 : f32
    %162 = vector.broadcast %cst_57 : f32 to vector<2x1xf32>
    %163 = arith.divf %162, %161 : vector<2x1xf32>
    %c0_58 = arith.constant 0 : index
    %c0_59 = arith.constant 0 : index
    %164 = vector.load %arg5[%c0_58, %c0_59] : memref<2x1xf32, #tpu.memory_space<vmem>>, vector<2x1xf32>
    tpu.vector_store %arg5[%c0_58, %c0_59], %163 {strides = array<i32>} : memref<2x1xf32, #tpu.memory_space<vmem>>, vector<2x1xf32>,
    return
  }
}

</mosaic_0001>

<bundles_post_ra>
// kernel: digitcaps_forward.2
= control target key start
LH: loop header
LB: loop body
LE: loop exit
PB: predicated region body
PF: predicated region fallthrough
CT: control target
= control target key end

     0   :  { %12 = vsyncpa [#allocation4], 0  ;;  %s8264_s0 = inlined_call_operand.hbm [shape: bf16[2,8,16,1152], index: 0, kind: input, shape index: {}]   ;;  %s8265_s1 = inlined_call_operand.vmem [shape: f32[2,1,16], index: 1, kind: input, shape index: {}]   ;;  %s8266_s2 = inlined_call_operand.<no memory space> [shape: f32[1], index: 2, kind: input, shape index: {}]   ;;  %s8267_s3 = inlined_call_operand.hbm [shape: f32[2,1152,8], index: 3, kind: input, shape index: {}]   ;;  %s8268_s4 = inlined_call_operand.vmem [shape: f32[2,32], index: 4, kind: output, shape index: {0}]   ;;  %s8269_s5 = inlined_call_operand.vmem [shape: f32[2,1], index: 5, kind: output, shape index: {1}]  }
   0x1   :  { %13 = vsyncpa [#allocation6], 0  ;;  %s7295_s18 = smov [#allocation3]   ;;  %s7247_s22 = scalar_lea.hbm %s8267_s3, 2304 }
   0x2   :  { %s19_s19 = sshll.u32 %s7295_s18, 4  ;;  %p7248_p0 = scmp.ne.s32.totalorder %s8267_s3, %s7247_s22  ;;  %s20_s19 = int_to_ptr.vmem [resolvable:$true] %s19_s19 }
   0x3   :  { %p7251_p1 = scmp.lt.u32.totalorder %s7247_s22, %s8267_s3 }
   0x5   :  { %p7253_p2 = pnand %p7251_p1, %p7248_p0 }
   0x7   :  { %7256 = shalt.err (!%p7253_p2)
}
   0x8   :  { %s7257_s27 = scalar_lea.vmem %s20_s19, 2304  ;;  %p7262_p4 = scmp.lt.s32.totalorder %s20_s19, %s20_s19 }
   0x9   :  { %p7258_p3 = scmp.ne.s32.totalorder %s20_s19, %s7257_s27  ;;  %p7263_p5 = scmp.lt.s32.totalorder %s7257_s27, %s7257_s27 }
   0xb   :  { %p7264_p6 = por %p7263_p5, %p7262_p4 }
   0xd   :  { %p7265_p7 = pnand %p7264_p6, %p7258_p3 }
   0xf   :  { %7268 = shalt.err (!%p7265_p7)
}
  0x10   :  { %s7296_s28 = smov 1152   ;;  %s7297_s29 = smov 72  }
  0x11   :  { %25 = dma.hbm_to_vmem [thread:$0]  %s8267_s3, 2304, %s20_s19, [#allocation4], %s7296_s28, %s7296_s28, %s7297_s29  }
  0x12   :  { %s7298_s7 = smov [#allocation5]   ;;  %s7269_s11 = scalar_lea.hbm %s8264_s0, 18432 }
  0x13   :  { %s31_s8 = sshll.u32 %s7298_s7, 4  ;;  %p7270_p8 = scmp.ne.s32.totalorder %s8264_s0, %s7269_s11  ;;  %s32_s8 = int_to_ptr.vmem [resolvable:$true] %s31_s8 }
  0x14   :  { %p7273_p9 = scmp.lt.u32.totalorder %s7269_s11, %s8264_s0 }
  0x16   :  { %p7275_p10 = pnand %p7273_p9, %p7270_p8 }
  0x18   :  { %7278 = shalt.err (!%p7275_p10)
}
  0x19   :  { %s7279_s16 = scalar_lea.vmem %s32_s8, 18432  ;;  %p7284_p12 = scmp.lt.s32.totalorder %s32_s8, %s32_s8 }
  0x1a   :  { %p7280_p11 = scmp.ne.s32.totalorder %s32_s8, %s7279_s16  ;;  %p7285_p13 = scmp.lt.s32.totalorder %s7279_s16, %s7279_s16 }
  0x1c   :  { %p7286_p0 = por %p7285_p13, %p7284_p12 }
  0x1e   :  { %p7287_p1 = pnand %p7286_p0, %p7280_p11 }
  0x20   :  { %7290 = shalt.err (!%p7287_p1)
}
  0x21   :  { %s7299_s3 = smov 576   ;;  %s7300_s17 = smov 36  }
  0x22   :  { %37 = dma.hbm_to_vmem [thread:$0]  %s8264_s0, 18432, %s32_s8, [#allocation6], %s7299_s3, %s7299_s3, %s7300_s17  }
  0x23   :  { %7291 = dma.done.wait [#allocation4], 2304  }
  0x24   :  { %7292 = vsyncadd [#allocation4], 4294964992 }
  0x25   :  { %7293 = dma.done.wait [#allocation6], 18432  }
  0x26   :  { %7294 = vsyncadd [#allocation6], 4294948864  ;;  %v7002_v0 = vld [vmem:[#allocation5 + $0x4] ss:$36 sps:$4 sm:$0xff]   ;;  %v7005_v2 = vld [vmem:[#allocation5 + $0x4c] ss:$36 sps:$4 sm:$0xff]   ;;  %v8270_v6 = vlaneseq }
  0x27   :  { %v7004_v1 = vld [vmem:[#allocation5] ss:$36 sps:$4 sm:$0xff]   ;;  %1041 = vmatprep.subr.bf16.mxu0 %v7002_v0  ;;  %v7007_v3 = vld [vmem:[#allocation5 + $0x48] ss:$36 sps:$4 sm:$0xff]   ;;  %1361 = vmatprep.subr.bf16.mxu1 %v7005_v2  ;;  %v8277_v7 = vmov 0.0   ;;  %vm7303_vm0 = vmmov 0  }
  0x28   :  { %1042 = vmatpush1.bf16.xpose.msra.mxu0 %v7004_v1  ;;  %v54_v4 = vld [vmem:[#allocation3] ss:$72 sm:$0x3]  ;;  %v73_v10 = vld [vmem:[#allocation3 + $0x10] ss:$72 sm:$0x3]  ;;  %1362 = vmatpush1.bf16.xpose.msra.mxu1 %v7007_v3 }
  0x29   :  { %v63_v5 = vld [vmem:[#allocation3 + $0x8] ss:$72 sm:$0x3]  ;;  %v55_v8 = vpack.c.bf16 %v8277_v7, %v54_v4  ;;  %v83_v11 = vld [vmem:[#allocation3 + $0x18] ss:$72 sm:$0x3]  ;;  %v75_v12 = vpack.c.bf16 %v8277_v7, %v73_v10 }
  0x2a   :  { %v65_v9 = vpack.c.bf16 %v8277_v7, %v63_v5  ;;  %v85_v13 = vpack.c.bf16 %v8277_v7, %v83_v11  ;;  %v93_v14 = vld [vmem:[#allocation3 + $0x20] ss:$72 sm:$0x3]  ;;  %v7302_v16 = vmov 1966171168   ;;  %v7368_v24 = vshrl.u32 %v8270_v6, 7 }
  0x2b   :  { %v103_v15 = vld [vmem:[#allocation3 + $0x28] ss:$72 sm:$0x3]  ;;  %v925_v17 = vunpack.c.l.s4 %v7302_v16  ;;  %57 = vst [vmem:[#allocation7] sm:$0x1] %v55_v8  ;;  %v95_v18 = vpack.c.bf16 %v8277_v7, %v93_v14  ;;  %vm3481_vm1 = vcmask 123904  }
  0x2c   :  { %67 = vst [vmem:[#allocation7 + $0x1] sm:$0x1] %v65_v9  ;;  %v105_v19 = vpack.c.bf16 %v8277_v7, %v103_v15  ;;  %v113_v20 = vld [vmem:[#allocation3 + $0x30] ss:$72 sm:$0x3]  ;;  %8292 = vst [vmem:[#allocation10_spill] sm:$0xff] %v7368_v24 }
  0x2d   :  { %v123_v21 = vld [vmem:[#allocation3 + $0x38] ss:$72 sm:$0x3]  ;;  %77 = vst [vmem:[#allocation7 + $0x2] sm:$0x1] %v75_v12  ;;  %v115_v22 = vpack.c.bf16 %v8277_v7, %v113_v20  ;;  %v926_v28 = vunpack.c.0.s8 %v925_v17  ;;  %vm3578_vm2 = vcmask 1041409  }
  0x2e   :  { %87 = vst [vmem:[#allocation7 + $0x3] sm:$0x1] %v85_v13  ;;  %v125_v23 = vpack.c.bf16 %v8277_v7, %v123_v21  ;;  %v7010_v25 = vld [vmem:[#allocation5 + $0xc] ss:$36 sps:$4 sm:$0xff]   ;;  %97 = vst [vmem:[#allocation7 + $0x4] sm:$0x1] %v95_v18 }
  0x2f   :  { %107 = vst [vmem:[#allocation7 + $0x5] sm:$0x1] %v105_v19  ;;  %v143_v26 = vld [vmem:[#allocation3 + $0x1] ss:$72 sm:$0x3]  ;;  %1081 = vmatprep.subr.bf16.mxu0 %v7010_v25  ;;  %v7379_v43 = vsub.s32 %v926_v28, %v7368_v24  ;;  %vm3580_vm3 = vcmask 1042434  }
  0x30   :  { %v154_v27 = vld [vmem:[#allocation3 + $0x9] ss:$72 sm:$0x3]  ;;  %117 = vst [vmem:[#allocation7 + $0x6] sm:$0x1] %v115_v22  ;;  %v145_v29 = vpack.c.bf16 %v8277_v7, %v143_v26  ;;  %vm3582_vm4 = vcmask 1043459  }
  0x31   :  { %127 = vst [vmem:[#allocation7 + $0x7] sm:$0x1] %v125_v23  ;;  %v156_v30 = vpack.c.bf16 %v8277_v7, %v154_v27  ;;  %v165_v31 = vld [vmem:[#allocation3 + $0x11] ss:$72 sm:$0x3]  ;;  %vm3584_vm5 = vcmask 1044484  }
  0x32   :  { %v176_v32 = vld [vmem:[#allocation3 + $0x19] ss:$72 sm:$0x3]  ;;  %v167_v33 = vpack.c.bf16 %v8277_v7, %v165_v31  ;;  %v198_v36 = vld [vmem:[#allocation3 + $0x29] ss:$72 sm:$0x3] }
  0x33   :  { %v178_v34 = vpack.c.bf16 %v8277_v7, %v176_v32  ;;  %v187_v35 = vld [vmem:[#allocation3 + $0x21] ss:$72 sm:$0x3]  ;;  %147 = vst [vmem:[#allocation7 + $0x9] sm:$0x1] %v145_v29  ;;  %v200_v38 = vpack.c.bf16 %v8277_v7, %v198_v36  ;;  %vm3586_vm6 = vcmask 1045509  }
  0x34   :  { %158 = vst [vmem:[#allocation7 + $0xa] sm:$0x1] %v156_v30  ;;  %v189_v37 = vpack.c.bf16 %v8277_v7, %v187_v35  ;;  %v209_v39 = vld [vmem:[#allocation3 + $0x31] ss:$72 sm:$0x3]  ;;  %vm3588_vm7 = vcmask 1046534  }
  0x35   :  { %v220_v40 = vld [vmem:[#allocation3 + $0x39] ss:$72 sm:$0x3]  ;;  %169 = vst [vmem:[#allocation7 + $0xb] sm:$0x1] %v167_v33  ;;  %v211_v41 = vpack.c.bf16 %v8277_v7, %v209_v39  ;;  %vm3590_vm8 = vcmask 1047559  }
  0x36   :  { %180 = vst [vmem:[#allocation7 + $0xc] sm:$0x1] %v178_v34  ;;  %v222_v42 = vpack.c.bf16 %v8277_v7, %v220_v40  ;;  %191 = vst [vmem:[#allocation7 + $0xd] sm:$0x1] %v189_v37  ;;  %v7013_v44 = vld [vmem:[#allocation5 + $0x54] ss:$36 sps:$4 sm:$0xff]  }
  0x37   :  { %202 = vst [vmem:[#allocation7 + $0xe] sm:$0x1] %v200_v38  ;;  %213 = vst [vmem:[#allocation7 + $0xf] sm:$0x1] %v211_v41  ;;  %1401 = vmatprep.subr.bf16.mxu1 %v7013_v44  ;;  %v7008_v48 = vld [vmem:[#allocation5 + $0x8] ss:$36 sps:$4 sm:$0xff]  }
  0x38   :  { %224 = vst [vmem:[#allocation7 + $0x10] sm:$0x1] %v222_v42  ;;  %v825_v45 = vld [vmem:[#allocation7] sm:$0xff]  ;;  %v7016_v54 = vld [vmem:[#allocation5 + $0x14] ss:$36 sps:$4 sm:$0xff]   ;;  %vm3593_vm9 = vcmask 15360  }
  0x39   :  { %v930_v46 = vrot.slane %v825_v45, %v7379_v43  ;;  %v923_v52 = vcombine.high %v825_v45, %v825_v45  ;;  %v133_v56 = vld [vmem:[#allocation3 + $0x40] ss:$72 sm:$0x3]  ;;  %v231_v57 = vld [vmem:[#allocation3 + $0x41] ss:$72 sm:$0x3] }
  0x3a   :  { %v7011_v59 = vld [vmem:[#allocation5 + $0x50] ss:$36 sps:$4 sm:$0xff]   ;;  %v135_v60 = vpack.c.bf16 %v8277_v7, %v133_v56  ;;  %v7019_v62 = vld [vmem:[#allocation5 + $0x5c] ss:$36 sps:$4 sm:$0xff]   ;;  %v233_v0 = vpack.c.bf16 %v8277_v7, %v231_v57  ;;  %s7304_s23 = smov 16   ;;  %vm6300_vm10 = vcmask 130048  }
  0x3b   :  { %v938_v47 = vcombine.high %v930_v46, %v930_v46  ;;  %v7383_v49 = vrot.slane %v930_v46, %v7379_v43  ;;  %v7401_v63 = vrot.slane %v923_v52, %v7379_v43  ;;  %v241_v1 = vld [vmem:[#allocation3 + $0x2] ss:$72 sm:$0x3]  ;;  %v263_v5 = vld [vmem:[#allocation3 + $0x12] ss:$72 sm:$0x3] }
  0x3c   :  { %v252_v2 = vld [vmem:[#allocation3 + $0xa] ss:$72 sm:$0x3]  ;;  %137 = vst [vmem:[#allocation7 + $0x8] sm:$0x1] %v135_v60  ;;  %v243_v9 = vpack.c.bf16 %v8277_v7, %v241_v1  ;;  %v265_v11 = vpack.c.bf16 %v8277_v7, %v263_v5  ;;  %vm6302_vm11 = vcmask 254976  }
  0x3d   :  { %v7386_v50 = vrot.slane %v938_v47, %v7379_v43  ;;  %v274_v8 = vld [vmem:[#allocation3 + $0x1a] ss:$72 sm:$0x3]  ;;  %235 = vst [vmem:[#allocation7 + $0x11] sm:$0x1] %v233_v0  ;;  %v254_v10 = vpack.c.bf16 %v8277_v7, %v252_v2  ;;  %v939_v19 = vcombine.high %v7401_v63, %v7401_v63  ;;  %v7428_v29 = vcombine.high %v7383_v49, %v7383_v49 }
  0x3e   :  { %v276_v12 = vpack.c.bf16 %v8277_v7, %v274_v8  ;;  %v285_v13 = vld [vmem:[#allocation3 + $0x22] ss:$72 sm:$0x3]  ;;  %v307_v17 = vld [vmem:[#allocation3 + $0x32] ss:$72 sm:$0x3] }
  0x3f   :  { %v827_v51 = vld [vmem:[#allocation7 + $0x9] sm:$0xff]  ;;  %1073 = vmatprep.mubr.bf16.mxu0 %v7386_v50  ;;  %v7392_v55 = vcombine.high %v7386_v50, %v7386_v50  ;;  %v296_v14 = vld [vmem:[#allocation3 + $0x2a] ss:$72 sm:$0x3]  ;;  %v287_v16 = vpack.c.bf16 %v8277_v7, %v285_v13  ;;  %245 = vst [vmem:[#allocation7 + $0x12] sm:$0x1] %v243_v9  ;;  %v309_v21 = vpack.c.bf16 %v8277_v7, %v307_v17 }
  0x40   :  { %v1250_v53 = vrot.slane %v827_v51, %v7379_v43  ;;  %1074 = vmatmul.mubr.bf16.vlgmr.msra.gmra.mrb[0].mxu0 %v7383_v49  ;;  %v1243_v4 = vcombine.high %v827_v51, %v827_v51  ;;  %v318_v18 = vld [vmem:[#allocation3 + $0x3a] ss:$72 sm:$0x3]  ;;  %256 = vst [vmem:[#allocation7 + $0x13] sm:$0x1] %v254_v10  ;;  %v298_v20 = vpack.c.bf16 %v8277_v7, %v296_v14  ;;  %vm6313_vm12 = vcmask 1024  }
  0x41   :  { %1082 = vmatpush1.bf16.xpose.msra.mxu0 %v7008_v48  ;;  %1113 = vmatprep.mubr.bf16.mxu0 %v7392_v55  ;;  %267 = vst [vmem:[#allocation7 + $0x14] sm:$0x1] %v265_v11  ;;  %278 = vst [vmem:[#allocation7 + $0x15] sm:$0x1] %v276_v12  ;;  %v320_v22 = vpack.c.bf16 %v8277_v7, %v318_v18  ;;  %v7014_v34 = vld [vmem:[#allocation5 + $0x10] ss:$36 sps:$4 sm:$0xff]   ;;  %v7433_v35 = vrot.slane %v939_v19, %v7379_v43 }
  0x42   :  { %v1258_v58 = vcombine.high %v1250_v53, %v1250_v53  ;;  %v7397_v61 = vrot.slane %v1250_v53, %v7379_v43  ;;  %1121 = vmatprep.subr.bf16.mxu0 %v7016_v54  ;;  %v1257_v23 = vrot.slane %v1243_v4, %v7379_v43  ;;  %289 = vst [vmem:[#allocation7 + $0x16] sm:$0x1] %v287_v16  ;;  %v339_v25 = vld [vmem:[#allocation3 + $0x3] ss:$72 sm:$0x3] }
  0x43   :  { %300 = vst [vmem:[#allocation7 + $0x17] sm:$0x1] %v298_v20  ;;  %311 = vst [vmem:[#allocation7 + $0x18] sm:$0x1] %v309_v21  ;;  %v341_v26 = vpack.c.bf16 %v8277_v7, %v339_v25  ;;  %v7023_v38 = vld [vmem:[#allocation5 + $0x1c] ss:$36 sps:$4 sm:$0xff]   ;;  %v7453_v53 = vrot.slane %v7401_v63, %v7379_v43  ;;  %v7457_v56 = vcombine.high %v7433_v35, %v7433_v35 }
  0x44   :  { %v7405_v3 = vrot.slane %v1258_v58, %v7379_v43  ;;  %322 = vst [vmem:[#allocation7 + $0x19] sm:$0x1] %v320_v22  ;;  %v350_v27 = vld [vmem:[#allocation3 + $0xb] ss:$72 sm:$0x3]  ;;  %v1259_v39 = vcombine.high %v1257_v23, %v1257_v23  ;;  %v7442_v46 = vcombine.high %v7397_v61, %v7397_v61  ;;  %v7463_v63 = vrot.slane %v1257_v23, %v7379_v43 }
  0x45   :  { %v361_v28 = vld [vmem:[#allocation3 + $0x13] ss:$72 sm:$0x3]  ;;  %v352_v30 = vpack.c.bf16 %v8277_v7, %v350_v27  ;;  %v383_v33 = vld [vmem:[#allocation3 + $0x23] ss:$72 sm:$0x3] }
  0x46   :  { %1393 = vmatprep.mubr.bf16.mxu1 %v7405_v3  ;;  %v7414_v15 = vcombine.high %v7405_v3, %v7405_v3  ;;  %v363_v31 = vpack.c.bf16 %v8277_v7, %v361_v28  ;;  %v372_v32 = vld [vmem:[#allocation3 + $0x1b] ss:$72 sm:$0x3]  ;;  %343 = vst [vmem:[#allocation7 + $0x1b] sm:$0x1] %v341_v26  ;;  %v385_v37 = vpack.c.bf16 %v8277_v7, %v383_v33 }
  0x47   :  { %1394 = vmatmul.mubr.bf16.vlgmr.msra.gmra.mrb[0].mxu1 %v7397_v61  ;;  %v374_v36 = vpack.c.bf16 %v8277_v7, %v372_v32  ;;  %354 = vst [vmem:[#allocation7 + $0x1c] sm:$0x1] %v352_v30  ;;  %v394_v40 = vld [vmem:[#allocation3 + $0x2b] ss:$72 sm:$0x3]  ;;  %v7447_v51 = vrot.slane %v1259_v39, %v7379_v43 }
  0x48   :  { %1402 = vmatpush1.bf16.xpose.msra.mxu1 %v7011_v59  ;;  %1433 = vmatprep.mubr.bf16.mxu1 %v7414_v15  ;;  %365 = vst [vmem:[#allocation7 + $0x1d] sm:$0x1] %v363_v31  ;;  %387 = vst [vmem:[#allocation7 + $0x1f] sm:$0x1] %v385_v37  ;;  %v396_v42 = vpack.c.bf16 %v8277_v7, %v394_v40  ;;  %v7017_v48 = vld [vmem:[#allocation5 + $0x58] ss:$36 sps:$4 sm:$0xff]   ;;  %v7488_v31 = vcombine.high %v7453_v53, %v7453_v53 }
  0x49   :  { %1441 = vmatprep.subr.bf16.mxu1 %v7019_v62  ;;  %376 = vst [vmem:[#allocation7 + $0x1e] sm:$0x1] %v374_v36  ;;  %v405_v41 = vld [vmem:[#allocation3 + $0x33] ss:$72 sm:$0x3]  ;;  %v7468_v2 = vcombine.high %v7447_v51, %v7447_v51 }
  0x4a   :  { %v407_v44 = vpack.c.bf16 %v8277_v7, %v405_v41  ;;  %v416_v45 = vld [vmem:[#allocation3 + $0x3b] ss:$72 sm:$0x3]  ;;  %398 = vst [vmem:[#allocation7 + $0x20] sm:$0x1] %v396_v42 }
  0x4b   :  { %v418_v47 = vpack.c.bf16 %v8277_v7, %v416_v45  ;;  %v7027_v52 = vld [vmem:[#allocation5 + $0x64] ss:$36 sps:$4 sm:$0xff]   ;;  %v7021_v54 = vld [vmem:[#allocation5 + $0x18] ss:$36 sps:$4 sm:$0xff]   ;;  %v7499_v45 = vcombine.high %v7463_v63, %v7463_v63 }
  0x4c   :  { %1114 = vmatmul.mubr.bf16.vlgmr.msra.gmra.mrb[0].mxu0 %v7428_v29  ;;  %409 = vst [vmem:[#allocation7 + $0x21] sm:$0x1] %v407_v44  ;;  %v329_v57 = vld [vmem:[#allocation3 + $0x42] ss:$72 sm:$0x3] }
  0x4d   :  { %1122 = vmatpush1.bf16.xpose.msra.mxu0 %v7014_v34  ;;  %1153 = vmatprep.mubr.bf16.mxu0 %v7433_v35  ;;  %420 = vst [vmem:[#allocation7 + $0x22] sm:$0x1] %v418_v47  ;;  %v331_v58 = vpack.c.bf16 %v8277_v7, %v329_v57  ;;  %v427_v59 = vld [vmem:[#allocation3 + $0x43] ss:$72 sm:$0x3] }
  0x4e   :  { %1161 = vmatprep.subr.bf16.mxu0 %v7023_v38  ;;  %v429_v60 = vpack.c.bf16 %v8277_v7, %v427_v59  ;;  %v7025_v62 = vld [vmem:[#allocation5 + $0x60] ss:$36 sps:$4 sm:$0xff]   ;;  %v437_v0 = vld [vmem:[#allocation3 + $0x4] ss:$72 sm:$0x3] }
  0x4f   :  { %333 = vst [vmem:[#allocation7 + $0x1a] sm:$0x1] %v331_v58  ;;  %v448_v1 = vld [vmem:[#allocation3 + $0xc] ss:$72 sm:$0x3]  ;;  %v439_v8 = vpack.c.bf16 %v8277_v7, %v437_v0  ;;  %v7490_v34 = vld [vmem:[#allocation7 + $0x12] sm:$0xff] }
  0x50   :  { %431 = vst [vmem:[#allocation7 + $0x23] sm:$0x1] %v429_v60  ;;  %v459_v4 = vld [vmem:[#allocation3 + $0x14] ss:$72 sm:$0x3]  ;;  %v450_v9 = vpack.c.bf16 %v8277_v7, %v448_v1  ;;  %v1570_v47 = vrot.slane %v7490_v34, %v7379_v43 }
  0x51   :  { %v470_v5 = vld [vmem:[#allocation3 + $0x1c] ss:$72 sm:$0x3]  ;;  %v461_v10 = vpack.c.bf16 %v8277_v7, %v459_v4  ;;  %v492_v13 = vld [vmem:[#allocation3 + $0x2c] ss:$72 sm:$0x3] }
  0x52   :  { %v472_v11 = vpack.c.bf16 %v8277_v7, %v470_v5  ;;  %v481_v12 = vld [vmem:[#allocation3 + $0x24] ss:$72 sm:$0x3]  ;;  %v503_v14 = vld [vmem:[#allocation3 + $0x34] ss:$72 sm:$0x3]  ;;  %v494_v18 = vpack.c.bf16 %v8277_v7, %v492_v13  ;;  %v1578_v58 = vcombine.high %v1570_v47, %v1570_v47 }
  0x53   :  { %1434 = vmatmul.mubr.bf16.vlgmr.msra.gmra.mrb[0].mxu1 %v7442_v46  ;;  %v514_v16 = vld [vmem:[#allocation3 + $0x3c] ss:$72 sm:$0x3]  ;;  %441 = vst [vmem:[#allocation7 + $0x24] sm:$0x1] %v439_v8  ;;  %v483_v17 = vpack.c.bf16 %v8277_v7, %v481_v12  ;;  %v505_v19 = vpack.c.bf16 %v8277_v7, %v503_v14 }
  0x54   :  { %1442 = vmatpush1.bf16.xpose.msra.mxu1 %v7017_v48  ;;  %1473 = vmatprep.mubr.bf16.mxu1 %v7447_v51  ;;  %452 = vst [vmem:[#allocation7 + $0x25] sm:$0x1] %v450_v9  ;;  %463 = vst [vmem:[#allocation7 + $0x26] sm:$0x1] %v461_v10  ;;  %v516_v20 = vpack.c.bf16 %v8277_v7, %v514_v16  ;;  %v7028_v32 = vld [vmem:[#allocation5 + $0x20] ss:$36 sps:$4 sm:$0xff]   ;;  %v7518_v4 = vrot.slane %v1578_v58, %v7379_v43 }
  0x55   :  { %1481 = vmatprep.subr.bf16.mxu1 %v7027_v52  ;;  %474 = vst [vmem:[#allocation7 + $0x27] sm:$0x1] %v472_v11  ;;  %v535_v21 = vld [vmem:[#allocation3 + $0x5] ss:$72 sm:$0x3] }
  0x56   :  { %v546_v22 = vld [vmem:[#allocation3 + $0xd] ss:$72 sm:$0x3]  ;;  %485 = vst [vmem:[#allocation7 + $0x28] sm:$0x1] %v483_v17  ;;  %v537_v23 = vpack.c.bf16 %v8277_v7, %v535_v21 }
  0x57   :  { %496 = vst [vmem:[#allocation7 + $0x29] sm:$0x1] %v494_v18  ;;  %507 = vst [vmem:[#allocation7 + $0x2a] sm:$0x1] %v505_v19  ;;  %v548_v25 = vpack.c.bf16 %v8277_v7, %v546_v22  ;;  %v7032_v33 = vld [vmem:[#allocation5 + $0x94] ss:$36 sps:$4 sm:$0xff]  }
  0x58   :  { %1154 = vmatmul.mubr.bf16.vlgmr.msra.gmra.mrb[0].mxu0 %v7453_v53  ;;  %518 = vst [vmem:[#allocation7 + $0x2b] sm:$0x1] %v516_v20  ;;  %v557_v26 = vld [vmem:[#allocation3 + $0x15] ss:$72 sm:$0x3] }
  0x59   :  { %1162 = vmatpush1.bf16.xpose.msra.mxu0 %v7021_v54  ;;  %1193 = vmatprep.mubr.bf16.mxu0 %v7457_v56  ;;  %v568_v27 = vld [vmem:[#allocation3 + $0x1d] ss:$72 sm:$0x3]  ;;  %v559_v28 = vpack.c.bf16 %v8277_v7, %v557_v26  ;;  %539 = vst [vmem:[#allocation7 + $0x2d] sm:$0x1] %v537_v23  ;;  %v7505_v54 = vld [vmem:[#allocation7 + $0x1b] sm:$0xff] }
  0x5a   :  { %6640 = vmatprep.subr.bf16.mxu0 %v8277_v7  ;;  %v570_v30 = vpack.c.bf16 %v8277_v7, %v568_v27  ;;  %550 = vst [vmem:[#allocation7 + $0x2e] sm:$0x1] %v548_v25  ;;  %v579_v36 = vld [vmem:[#allocation3 + $0x25] ss:$72 sm:$0x3]  ;;  %v7512_v59 = vrot.slane %v7505_v54, %v7379_v43 }
  0x5b   :  { %561 = vst [vmem:[#allocation7 + $0x2f] sm:$0x1] %v559_v28  ;;  %v590_v37 = vld [vmem:[#allocation3 + $0x2d] ss:$72 sm:$0x3]  ;;  %v581_v38 = vpack.c.bf16 %v8277_v7, %v579_v36 }
  0x5c   :  { %572 = vst [vmem:[#allocation7 + $0x30] sm:$0x1] %v570_v30  ;;  %v592_v39 = vpack.c.bf16 %v8277_v7, %v590_v37  ;;  %v601_v40 = vld [vmem:[#allocation3 + $0x35] ss:$72 sm:$0x3]  ;;  %v1898_v10 = vcombine.high %v7512_v59, %v7512_v59 }
  0x5d   :  { %v612_v41 = vld [vmem:[#allocation3 + $0x3d] ss:$72 sm:$0x3]  ;;  %v603_v42 = vpack.c.bf16 %v8277_v7, %v601_v40  ;;  %583 = vst [vmem:[#allocation7 + $0x31] sm:$0x1] %v581_v38  ;;  %v7540_v38 = vrot.slane %v1570_v47, %v7379_v43 }
  0x5e   :  { %v614_v44 = vpack.c.bf16 %v8277_v7, %v612_v41  ;;  %594 = vst [vmem:[#allocation7 + $0x32] sm:$0x1] %v592_v39  ;;  %v7029_v48 = vld [vmem:[#allocation5 + $0x68] ss:$36 sps:$4 sm:$0xff]   ;;  %v7035_v52 = vld [vmem:[#allocation5 + $0xdc] ss:$36 sps:$4 sm:$0xff]   ;;  %v7532_v23 = vrot.slane %v1898_v10, %v7379_v43  ;;  %v1563_v39 = vcombine.high %v7490_v34, %v7490_v34 }
  0x5f   :  { %1474 = vmatmul.mubr.bf16.vlgmr.msra.gmra.mrb[0].mxu1 %v7463_v63  ;;  %605 = vst [vmem:[#allocation7 + $0x33] sm:$0x1] %v603_v42  ;;  %v6453_v57 = vld.sshfl [vmem:[#allocation7 + $0x8] sm:$0x1 pattern:$0x75316420] }
  0x60   :  { %1482 = vmatpush1.bf16.xpose.msra.mxu1 %v7025_v62  ;;  %1513 = vmatprep.mubr.bf16.mxu1 %v7468_v2  ;;  %616 = vst [vmem:[#allocation7 + $0x34] sm:$0x1] %v614_v44  ;;  %v7030_v60 = vld [vmem:[#allocation5 + $0x90] ss:$36 sps:$4 sm:$0xff]   ;;  %v7515_v62 = vrot.slane %v6453_v57, %v7379_v43  ;;  %v7038_v0 = vld [vmem:[#allocation5 + $0x9c] ss:$36 sps:$4 sm:$0xff]   ;;  %v7548_v44 = vcombine.high %v7518_v4, %v7518_v4 }
  0x61   :  { %6646 = vmatprep.subr.bf16.mxu1 %v8277_v7  ;;  %v525_v1 = vld [vmem:[#allocation3 + $0x44] ss:$72 sm:$0x3]  ;;  %v623_v8 = vld [vmem:[#allocation3 + $0x45] ss:$72 sm:$0x3] }
  0x62   :  { %v527_v5 = vpack.c.bf16 %v8277_v7, %v525_v1  ;;  %v6463_v9 = vld.sshfl [vmem:[#allocation7 + $0x11] sm:$0x1 pattern:$0x75316420]  ;;  %v625_v11 = vpack.c.bf16 %v8277_v7, %v623_v8  ;;  %v7033_v14 = vld [vmem:[#allocation5 + $0xd8] ss:$36 sps:$4 sm:$0xff]   ;;  %v7559_v8 = vrot.slane %v7512_v59, %v7379_v43 }
  0x63   :  { %v633_v12 = vld [vmem:[#allocation3 + $0x6] ss:$72 sm:$0x3]  ;;  %v655_v18 = vld [vmem:[#allocation3 + $0x16] ss:$72 sm:$0x3]  ;;  %v7528_v20 = vrot.slane %v6463_v9, %v7379_v43 }
  0x64   :  { %1194 = vmatmul.mubr.bf16.vlgmr.msra.gmra.mrb[0].mxu0 %v7488_v31  ;;  %529 = vst [vmem:[#allocation7 + $0x2c] sm:$0x1] %v527_v5  ;;  %v644_v13 = vld [vmem:[#allocation3 + $0xe] ss:$72 sm:$0x3]  ;;  %v635_v16 = vpack.c.bf16 %v8277_v7, %v633_v12  ;;  %v657_v25 = vpack.c.bf16 %v8277_v7, %v655_v18 }
  0x65   :  { %6641 = vmatpush3.bf16.xpose.msra.mxu0 %v7028_v32  ;;  %6642 = vmatprep.mubr.msk.bf16.mxu0 %vm7303_vm0, %v8277_v7  ;;  %627 = vst [vmem:[#allocation7 + $0x35] sm:$0x1] %v625_v11  ;;  %v646_v17 = vpack.c.bf16 %v8277_v7, %v644_v13  ;;  %v666_v19 = vld [vmem:[#allocation3 + $0x1e] ss:$72 sm:$0x3] }
  0x66   :  { %1681 = vmatprep.subr.bf16.mxu0 %v7032_v33  ;;  %v677_v21 = vld [vmem:[#allocation3 + $0x26] ss:$72 sm:$0x3]  ;;  %637 = vst [vmem:[#allocation7 + $0x36] sm:$0x1] %v635_v16  ;;  %v668_v26 = vpack.c.bf16 %v8277_v7, %v666_v19  ;;  %v1883_v16 = vcombine.high %v7505_v54, %v7505_v54  ;;  %v7577_v54 = vcombine.high %v7540_v38, %v7540_v38 }
  0x67   :  { %v688_v22 = vld [vmem:[#allocation3 + $0x2e] ss:$72 sm:$0x3]  ;;  %648 = vst [vmem:[#allocation7 + $0x37] sm:$0x1] %v646_v17  ;;  %v679_v27 = vpack.c.bf16 %v8277_v7, %v677_v21 }
  0x68   :  { %v699_v28 = vld [vmem:[#allocation3 + $0x36] ss:$72 sm:$0x3]  ;;  %v7036_v32 = vld [vmem:[#allocation5 + $0x98] ss:$36 sps:$4 sm:$0xff]   ;;  %v690_v36 = vpack.c.bf16 %v8277_v7, %v688_v22  ;;  %v1897_v21 = vrot.slane %v1883_v16, %v7379_v43 }
  0x69   :  { %v710_v30 = vld [vmem:[#allocation3 + $0x3e] ss:$72 sm:$0x3]  ;;  %v7041_v33 = vld [vmem:[#allocation5 + $0xe4] ss:$36 sps:$4 sm:$0xff]   ;;  %v701_v37 = vpack.c.bf16 %v8277_v7, %v699_v28  ;;  %v7585_v28 = vcombine.high %v7559_v8, %v7559_v8 }
  0x6a   :  { %659 = vst [vmem:[#allocation7 + $0x38] sm:$0x1] %v657_v25  ;;  %670 = vst [vmem:[#allocation7 + $0x39] sm:$0x1] %v668_v26  ;;  %v712_v40 = vpack.c.bf16 %v8277_v7, %v710_v30  ;;  %v7044_v57 = vld [vmem:[#allocation5 + $0xa4] ss:$36 sps:$4 sm:$0xff]  }
  0x6b   :  { %1514 = vmatmul.mubr.bf16.vlgmr.msra.gmra.mrb[0].mxu1 %v7499_v45  ;;  %681 = vst [vmem:[#allocation7 + $0x3a] sm:$0x1] %v679_v27  ;;  %v731_v41 = vld [vmem:[#allocation3 + $0x7] ss:$72 sm:$0x3]  ;;  %v1899_v27 = vcombine.high %v1897_v21, %v1897_v21 }
  0x6c   :  { %6647 = vmatpush3.bf16.xpose.msra.mxu1 %v7029_v48  ;;  %6648 = vmatprep.mubr.msk.bf16.mxu1 %vm7303_vm0, %v8277_v7  ;;  %v742_v42 = vld [vmem:[#allocation3 + $0xf] ss:$72 sm:$0x3]  ;;  %692 = vst [vmem:[#allocation7 + $0x3b] sm:$0x1] %v690_v36  ;;  %v733_v47 = vpack.c.bf16 %v8277_v7, %v731_v41 }
  0x6d   :  { %2001 = vmatprep.subr.bf16.mxu1 %v7035_v52  ;;  %703 = vst [vmem:[#allocation7 + $0x3c] sm:$0x1] %v701_v37  ;;  %v744_v48 = vpack.c.bf16 %v8277_v7, %v742_v42  ;;  %v753_v34 = vld [vmem:[#allocation3 + $0x17] ss:$72 sm:$0x3]  ;;  %v7602_v42 = vrot.slane %v1897_v21, %v7379_v43 }
  0x6e   :  { %v764_v52 = vld [vmem:[#allocation3 + $0x1f] ss:$72 sm:$0x3]  ;;  %714 = vst [vmem:[#allocation7 + $0x3d] sm:$0x1] %v712_v40  ;;  %v755_v58 = vpack.c.bf16 %v8277_v7, %v753_v34 }
  0x6f   :  { %735 = vst [vmem:[#allocation7 + $0x3f] sm:$0x1] %v733_v47  ;;  %746 = vst [vmem:[#allocation7 + $0x40] sm:$0x1] %v744_v48  ;;  %v7039_v13 = vld [vmem:[#allocation5 + $0xe0] ss:$36 sps:$4 sm:$0xff]  }
  0x70   :  { %6643 = vmatmul.mubr.bf16.vlgmr.msra.gmra.mrb[0].mxu0 %v7515_v62  ;;  %757 = vst [vmem:[#allocation7 + $0x41] sm:$0x1] %v755_v58  ;;  %v775_v1 = vld [vmem:[#allocation3 + $0x27] ss:$72 sm:$0x3] }
  0x71   :  { %1682 = vmatpush1.bf16.xpose.msra.mxu0 %v7030_v60  ;;  %1713 = vmatprep.mubr.bf16.mxu0 %v7518_v4  ;;  %v766_v60 = vpack.c.bf16 %v8277_v7, %v764_v52  ;;  %v786_v5 = vld [vmem:[#allocation3 + $0x2f] ss:$72 sm:$0x3]  ;;  %v777_v9 = vpack.c.bf16 %v8277_v7, %v775_v1  ;;  %v808_v12 = vld [vmem:[#allocation3 + $0x3f] ss:$72 sm:$0x3] }
  0x72   :  { %1721 = vmatprep.subr.bf16.mxu0 %v7038_v0  ;;  %v1577_v0 = vrot.slane %v1563_v39, %v7379_v43  ;;  %v788_v10 = vpack.c.bf16 %v8277_v7, %v786_v5  ;;  %v797_v11 = vld [vmem:[#allocation3 + $0x37] ss:$72 sm:$0x3]  ;;  %v810_v17 = vpack.c.bf16 %v8277_v7, %v808_v12  ;;  %v721_v40 = vld [vmem:[#allocation3 + $0x46] ss:$72 sm:$0x3]  ;;  %v7622_v5 = vcombine.high %v7602_v42, %v7602_v42 }
  0x73   :  { %768 = vst [vmem:[#allocation7 + $0x42] sm:$0x1] %v766_v60  ;;  %v799_v59 = vpack.c.bf16 %v8277_v7, %v797_v11  ;;  %v7047_v18 = vld [vmem:[#allocation5 + $0xec] ss:$36 sps:$4 sm:$0xff]   ;;  %779 = vst [vmem:[#allocation7 + $0x43] sm:$0x1] %v777_v9  ;;  %v723_v47 = vpack.c.bf16 %v8277_v7, %v721_v40 }
  0x74   :  { %790 = vst [vmem:[#allocation7 + $0x44] sm:$0x1] %v788_v10  ;;  %812 = vst [vmem:[#allocation7 + $0x46] sm:$0x1] %v810_v17  ;;  %v1579_v19 = vcombine.high %v1577_v0, %v1577_v0  ;;  %v7042_v22 = vld [vmem:[#allocation5 + $0xa0] ss:$36 sps:$4 sm:$0xff]   ;;  %v7594_v37 = vrot.slane %v1577_v0, %v7379_v43 }
  0x75   :  { %801 = vst [vmem:[#allocation7 + $0x45] sm:$0x1] %v799_v59  ;;  %v7050_v25 = vld [vmem:[#allocation5 + $0xac] ss:$36 sps:$4 sm:$0xff]   ;;  %725 = vst [vmem:[#allocation7 + $0x3e] sm:$0x1] %v723_v47 }
  0x76   :  { %v7580_v26 = vrot.slane %v1579_v19, %v7379_v43  ;;  %v7045_v30 = vld [vmem:[#allocation5 + $0xe8] ss:$36 sps:$4 sm:$0xff]   ;;  %v819_v41 = vld [vmem:[#allocation3 + $0x47] ss:$72 sm:$0x3]  ;;  %v7617_v58 = vcombine.high %v7594_v37, %v7594_v37 }
  0x77   :  { %6649 = vmatmul.mubr.bf16.vlgmr.msra.gmra.mrb[0].mxu1 %v7528_v20  ;;  %v7048_v36 = vld [vmem:[#allocation5 + $0xa8] ss:$36 sps:$4 sm:$0xff]   ;;  %v821_v48 = vpack.c.bf16 %v8277_v7, %v819_v41  ;;  %v7052_v34 = vld [vmem:[#allocation5 + $0xf0] ss:$36 sps:$4 sm:$0xff]   ;;  %v7056_v1 = vld [vmem:[#allocation5 + $0xf8] ss:$36 sps:$4 sm:$0xff]  }
  0x78   :  { %2002 = vmatpush1.bf16.xpose.msra.mxu1 %v7033_v14  ;;  %2033 = vmatprep.mubr.bf16.mxu1 %v7532_v23  ;;  %v7566_v14 = vcombine.high %v7532_v23, %v7532_v23  ;;  %v7598_v39 = vcombine.high %v7580_v26, %v7580_v26  ;;  %v7059_v60 = vld [vmem:[#allocation5 + $0x124] ss:$36 sps:$4 sm:$0xff]   ;;  %v7062_v10 = vld [vmem:[#allocation5 + $0x16c] ss:$36 sps:$4 sm:$0xff]  }
  0x79   :  { %2041 = vmatprep.subr.bf16.mxu1 %v7041_v33  ;;  %1714 = vmatmul.mubr.bf16.vlgmr.msra.gmra.mrb[4].mxu0 %v7540_v38  ;;  %v7589_v33 = vrot.slane %v1899_v27, %v7379_v43  ;;  %823 = vst [vmem:[#allocation7 + $0x47] sm:$0x1] %v821_v48  ;;  %v833_v0 = vld [vmem:[#allocation7 + $0x24] sm:$0xff]  ;;  %v835_v11 = vld [vmem:[#allocation7 + $0x2d] sm:$0xff] }
  0x7a   :  { %1722 = vmatpush1.bf16.xpose.msra.mxu0 %v7036_v32  ;;  %1753 = vmatprep.mubr.bf16.mxu0 %v7548_v44  ;;  %v7054_v32 = vld [vmem:[#allocation5 + $0xf4] ss:$36 sps:$4 sm:$0xff]   ;;  %v2210_v9 = vrot.slane %v833_v0, %v7379_v43  ;;  %v2530_v16 = vrot.slane %v835_v11, %v7379_v43  ;;  %v7057_v17 = vld [vmem:[#allocation5 + $0x120] ss:$36 sps:$4 sm:$0xff]   ;;  %v7065_v21 = vld [vmem:[#allocation5 + $0x12c] ss:$36 sps:$4 sm:$0xff]   ;;  %v2203_v47 = vcombine.high %v833_v0, %v833_v0 }
  0x7b   :  { %1761 = vmatprep.subr.bf16.mxu0 %v7044_v57  ;;  %v7610_v52 = vcombine.high %v7589_v33, %v7589_v33  ;;  %v7055_v57 = vld [vmem:[#allocation5 + $0xb0] ss:$36 sps:$4 sm:$0xff]   ;;  %v6473_v12 = vld.sshfl [vmem:[#allocation7 + $0x1a] sm:$0x1 pattern:$0x75316420] }
  0x7c   :  { %v7632_v59 = vrot.slane %v6473_v12, %v7379_v43  ;;  %v6483_v19 = vld.sshfl [vmem:[#allocation7 + $0x23] sm:$0x1 pattern:$0x75316420]  ;;  %v7060_v27 = vld [vmem:[#allocation5 + $0x168] ss:$36 sps:$4 sm:$0xff]  }
  0x7d   :  { %v7063_v40 = vld [vmem:[#allocation5 + $0x128] ss:$36 sps:$4 sm:$0xff]   ;;  %v7071_v48 = vld [vmem:[#allocation5 + $0x134] ss:$36 sps:$4 sm:$0xff]  }
  0x7f   :  { %2034 = vmatmul.mubr.bf16.vlgmr.msra.gmra.mrb[4].mxu1 %v7559_v8 }
  0x80   :  { %2042 = vmatpush1.bf16.xpose.msra.mxu1 %v7039_v13  ;;  %2073 = vmatprep.mubr.bf16.mxu1 %v7566_v14  ;;  %v2218_v13 = vcombine.high %v2210_v9, %v2210_v9 }
  0x81   :  { %2081 = vmatprep.subr.bf16.mxu1 %v7047_v18 }
  0x82   :  { %v7635_v18 = vrot.slane %v2218_v13, %v7379_v43 }
  0x84   :  { %v7651_v41 = vcombine.high %v7635_v18, %v7635_v18 }
  0x85   :  { %1754 = vmatmul.mubr.bf16.vlgmr.msra.gmra.mrb[4].mxu0 %v7577_v54 }
  0x86   :  { %1762 = vmatpush1.bf16.xpose.msra.mxu0 %v7042_v22  ;;  %1793 = vmatprep.mubr.bf16.mxu0 %v7580_v26  ;;  %v2538_v22 = vcombine.high %v2530_v16, %v2530_v16 }
  0x87   :  { %1801 = vmatprep.subr.bf16.mxu0 %v7050_v25  ;;  %v7639_v25 = vrot.slane %v6483_v19, %v7379_v43  ;;  %v7077_v19 = vld [vmem:[#allocation5 + $0x13c] ss:$36 sps:$4 sm:$0xff]  }
  0x8b   :  { %2074 = vmatmul.mubr.bf16.vlgmr.msra.gmra.mrb[4].mxu1 %v7585_v28 }
  0x8c   :  { %2082 = vmatpush1.bf16.xpose.msra.mxu1 %v7045_v30  ;;  %2113 = vmatprep.mubr.bf16.mxu1 %v7589_v33  ;;  %v7643_v30 = vrot.slane %v2538_v22, %v7379_v43  ;;  %v7072_v22 = vld [vmem:[#allocation5 + $0x178] ss:$36 sps:$4 sm:$0xff]  }
  0x8d   :  { %2121 = vmatprep.subr.bf16.mxu1 %v7054_v32  ;;  %v7068_v32 = vld [vmem:[#allocation5 + $0x174] ss:$36 sps:$4 sm:$0xff]  }
  0x8e   :  { %v7662_v0 = vcombine.high %v7643_v30, %v7643_v30 }
  0x91   :  { %1794 = vmatmul.mubr.bf16.vlgmr.msra.gmra.mrb[4].mxu0 %v7594_v37 }
  0x92   :  { %1802 = vmatpush1.bf16.xpose.msra.mxu0 %v7048_v36  ;;  %1833 = vmatprep.mubr.bf16.mxu0 %v7598_v39  ;;  %v7646_v36 = vrot.slane %v2210_v9, %v7379_v43  ;;  %v7074_v9 = vld [vmem:[#allocation5 + $0x17c] ss:$36 sps:$4 sm:$0xff]  }
  0x93   :  { %6652 = vmatprep.subr.bf16.mxu0 %v8277_v7 }
  0x94   :  { %v7669_v13 = vcombine.high %v7646_v36, %v7646_v36 }
  0x97   :  { %2114 = vmatmul.mubr.bf16.vlgmr.msra.gmra.mrb[4].mxu1 %v7602_v42 }
  0x98   :  { %2122 = vmatpush1.bf16.xpose.msra.mxu1 %v7052_v34  ;;  %2153 = vmatprep.mubr.bf16.mxu1 %v7610_v52  ;;  %v7656_v34 = vrot.slane %v2530_v16, %v7379_v43  ;;  %v7069_v16 = vld [vmem:[#allocation5 + $0x130] ss:$36 sps:$4 sm:$0xff]  }
  0x99   :  { %6658 = vmatprep.subr.bf16.mxu1 %v8277_v7 }
  0x9d   :  { %1834 = vmatmul.mubr.bf16.vlgmr.msra.gmra.mrb[4].mxu0 %v7617_v58 }
  0x9e   :  { %6653 = vmatpush3.bf16.xpose.msra.mxu0 %v7055_v57  ;;  %6654 = vmatprep.mubr.msk.bf16.mxu0 %vm7303_vm0, %v8277_v7  ;;  %v2217_v57 = vrot.slane %v2203_v47, %v7379_v43  ;;  %v7075_v47 = vld [vmem:[#allocation5 + $0x138] ss:$36 sps:$4 sm:$0xff]  }
  0x9f   :  { %2321 = vmatprep.subr.bf16.mxu0 %v7059_v60  ;;  %v7066_v60 = vld [vmem:[#allocation5 + $0x170] ss:$36 sps:$4 sm:$0xff]  }
  0xa3   :  { %2154 = vmatmul.mubr.bf16.vlgmr.msra.gmra.mrb[4].mxu1 %v7622_v5 }
  0xa4   :  { %6659 = vmatpush3.bf16.xpose.msra.mxu1 %v7056_v1  ;;  %6660 = vmatprep.mubr.msk.bf16.mxu1 %vm7303_vm0, %v8277_v7  ;;  %v2523_v1 = vcombine.high %v835_v11, %v835_v11 }
  0xa5   :  { %2641 = vmatprep.subr.bf16.mxu1 %v7062_v10  ;;  %v2219_v10 = vcombine.high %v2217_v57, %v2217_v57 }
  0xa6   :  { %v2537_v12 = vrot.slane %v2523_v1, %v7379_v43  ;;  %v7079_v1 = vld [vmem:[#allocation5 + $0x180] ss:$36 sps:$4 sm:$0xff]  }
  0xa8   :  { %v2539_v11 = vcombine.high %v2537_v12, %v2537_v12 }
  0xa9   :  { %6655 = vmatmul.mubr.bf16.vlgmr.msra.gmra.mrb[4].mxu0 %v7632_v59 }
  0xaa   :  { %2322 = vmatpush1.bf16.xpose.msra.mxu0 %v7057_v17  ;;  %2353 = vmatprep.mubr.bf16.mxu0 %v7635_v18  ;;  %v7672_v17 = vrot.slane %v2219_v10, %v7379_v43  ;;  %v7082_v10 = vld [vmem:[#allocation5 + $0x140] ss:$36 sps:$4 sm:$0xff]  }
  0xab   :  { %2361 = vmatprep.subr.bf16.mxu0 %v7065_v21  ;;  %v7677_v21 = vcombine.high %v7656_v34, %v7656_v34 }
  0xaf   :  { %6661 = vmatmul.mubr.bf16.vlgmr.msra.gmra.mrb[4].mxu1 %v7639_v25 }
  0xb0   :  { %2642 = vmatpush1.bf16.xpose.msra.mxu1 %v7060_v27  ;;  %2673 = vmatprep.mubr.bf16.mxu1 %v7643_v30  ;;  %v7681_v27 = vrot.slane %v2539_v11, %v7379_v43 }
  0xb1   :  { %2681 = vmatprep.subr.bf16.mxu1 %v7068_v32  ;;  %2354 = vmatmul.mubr.bf16.vlgmr.msra.gmra.mrb[8].mxu0 %v7646_v36  ;;  %v7081_v32 = vld [vmem:[#allocation5 + $0x184] ss:$36 sps:$4 sm:$0xff]  }
  0xb2   :  { %2362 = vmatpush1.bf16.xpose.msra.mxu0 %v7063_v40  ;;  %2393 = vmatprep.mubr.bf16.mxu0 %v7651_v41  ;;  %v7686_v40 = vrot.slane %v2217_v57, %v7379_v43  ;;  %v7700_v57 = vcombine.high %v7681_v27, %v7681_v27 }
  0xb3   :  { %2401 = vmatprep.subr.bf16.mxu0 %v7071_v48  ;;  %v7690_v48 = vcombine.high %v7672_v17, %v7672_v17 }
  0xb4   :  { %8295 = vst [vmem:[#allocation13_spill] sm:$0xff] %v7700_v57 }
  0xb5   :  { %8293 = vst [vmem:[#allocation11_spill] sm:$0xff] %v7690_v48 }
  0xb7   :  { %2674 = vmatmul.mubr.bf16.vlgmr.msra.gmra.mrb[8].mxu1 %v7656_v34 }
  0xb8   :  { %2682 = vmatpush1.bf16.xpose.msra.mxu1 %v7066_v60  ;;  %2713 = vmatprep.mubr.bf16.mxu1 %v7662_v0  ;;  %v7694_v60 = vrot.slane %v2537_v12, %v7379_v43  ;;  %v7086_v12 = vld [vmem:[#allocation5 + $0x1b4] ss:$36 sps:$4 sm:$0xff]  }
  0xb9   :  { %2721 = vmatprep.subr.bf16.mxu1 %v7074_v9  ;;  %v7707_v9 = vcombine.high %v7686_v40, %v7686_v40 }
  0xba   :  { %8294 = vst [vmem:[#allocation12_spill] sm:$0xff] %v7694_v60 }
  0xbb   :  { %8296 = vst [vmem:[#allocation14_spill] sm:$0xff] %v7707_v9 }
  0xbd   :  { %2394 = vmatmul.mubr.bf16.vlgmr.msra.gmra.mrb[8].mxu0 %v7669_v13 }
  0xbe   :  { %2402 = vmatpush1.bf16.xpose.msra.mxu0 %v7069_v16  ;;  %2433 = vmatprep.mubr.bf16.mxu0 %v7672_v17  ;;  %v837_v16 = vld [vmem:[#allocation7 + $0x36] sm:$0xff] }
  0xbf   :  { %2441 = vmatprep.subr.bf16.mxu0 %v7077_v19  ;;  %v7712_v19 = vcombine.high %v7694_v60, %v7694_v60  ;;  %v2850_v11 = vrot.slane %v837_v16, %v7379_v43 }
  0xc1   :  { %8297 = vst [vmem:[#allocation15_spill] sm:$0xff] %v7712_v19  ;;  %v2858_v6 = vcombine.high %v2850_v11, %v2850_v11 }
  0xc3   :  { %2714 = vmatmul.mubr.bf16.vlgmr.msra.gmra.mrb[8].mxu1 %v7677_v21 }
  0xc4   :  { %2722 = vmatpush1.bf16.xpose.msra.mxu1 %v7072_v22  ;;  %2753 = vmatprep.mubr.bf16.mxu1 %v7681_v27  ;;  %v7083_v22 = vld [vmem:[#allocation5 + $0x188] ss:$36 sps:$4 sm:$0xff]  }
  0xc5   :  { %2761 = vmatprep.subr.bf16.mxu1 %v7081_v32  ;;  %v7089_v32 = vld [vmem:[#allocation5 + $0x1fc] ss:$36 sps:$4 sm:$0xff]  }
  0xc9   :  { %2434 = vmatmul.mubr.bf16.vlgmr.msra.gmra.mrb[8].mxu0 %v7686_v40 }
  0xca   :  { %2442 = vmatpush1.bf16.xpose.msra.mxu0 %v7075_v47  ;;  %2473 = vmatprep.mubr.bf16.mxu0 %v7690_v48  ;;  %v839_v47 = vld [vmem:[#allocation7 + $0x3f] sm:$0xff] }
  0xcb   :  { %6664 = vmatprep.subr.bf16.mxu0 %v8277_v7 }
  0xcf   :  { %2754 = vmatmul.mubr.bf16.vlgmr.msra.gmra.mrb[8].mxu1 %v7694_v60  ;;  %v7092_v60 = vld [vmem:[#allocation5 + $0x1bc] ss:$36 sps:$4 sm:$0xff]  }
  0xd0   :  { %2762 = vmatpush1.bf16.xpose.msra.mxu1 %v7079_v1  ;;  %2793 = vmatprep.mubr.bf16.mxu1 %v7700_v57  ;;  %v6493_v1 = vld.sshfl [vmem:[#allocation7 + $0x2c] sm:$0x1 pattern:$0x75316420]  ;;  %v7725_v57 = vrot.slane %v2858_v6, %v7379_v43  ;;  %v7736_v6 = vrot.slane %v2850_v11, %v7379_v43  ;;  %v7093_v11 = vld [vmem:[#allocation5 + $0x200] ss:$36 sps:$4 sm:$0xff]  }
  0xd1   :  { %6670 = vmatprep.subr.bf16.mxu1 %v8277_v7  ;;  %v7722_v24 = vrot.slane %v6493_v1, %v7379_v43  ;;  %v7095_v1 = vld [vmem:[#allocation5 + $0x204] ss:$36 sps:$4 sm:$0xff]  }
  0xd3   :  { %8298 = vst [vmem:[#allocation16_spill] sm:$0xff] %v7722_v24 }
  0xd5   :  { %2474 = vmatmul.mubr.bf16.vlgmr.msra.gmra.mrb[8].mxu0 %v7707_v9  ;;  %v7084_v9 = vld [vmem:[#allocation5 + $0x1b0] ss:$36 sps:$4 sm:$0xff]  }
  0xd6   :  { %6665 = vmatpush3.bf16.xpose.msra.mxu0 %v7082_v10  ;;  %6666 = vmatprep.mubr.msk.bf16.mxu0 %vm7303_vm0, %v8277_v7  ;;  %v3170_v10 = vrot.slane %v839_v47, %v7379_v43 }
  0xd7   :  { %2961 = vmatprep.subr.bf16.mxu0 %v7086_v12  ;;  %v6503_v12 = vld.sshfl [vmem:[#allocation7 + $0x35] sm:$0x1 pattern:$0x75316420] }
  0xd8   :  { %v3178_v48 = vcombine.high %v3170_v10, %v3170_v10 }
  0xdb   :  { %2794 = vmatmul.mubr.bf16.vlgmr.msra.gmra.mrb[8].mxu1 %v7712_v19  ;;  %v7090_v19 = vld [vmem:[#allocation5 + $0x1b8] ss:$36 sps:$4 sm:$0xff]  }
  0xdc   :  { %6671 = vmatpush3.bf16.xpose.msra.mxu1 %v7083_v22  ;;  %6672 = vmatprep.mubr.msk.bf16.mxu1 %vm7303_vm0, %v8277_v7  ;;  %v7729_v22 = vrot.slane %v6503_v12, %v7379_v43  ;;  %v7087_v7 = vld [vmem:[#allocation5 + $0x1f8] ss:$36 sps:$4 sm:$0xff]   ;;  %v2843_v12 = vcombine.high %v837_v16, %v837_v16 }
  0xdd   :  { %3281 = vmatprep.subr.bf16.mxu1 %v7089_v32  ;;  %v7733_v32 = vrot.slane %v3178_v48, %v7379_v43  ;;  %v7746_v48 = vrot.slane %v3170_v10, %v7379_v43  ;;  %v7759_v10 = vcombine.high %v7736_v6, %v7736_v6 }
  0xde   :  { %8299 = vst [vmem:[#allocation17_spill] sm:$0xff] %v7729_v22 }
  0xdf   :  { %v7752_v16 = vcombine.high %v7733_v32, %v7733_v32  ;;  %8302 = vst [vmem:[#allocation20_spill] sm:$0xff] %v7759_v10 }
  0xe1   :  { %6667 = vmatmul.mubr.bf16.vlgmr.msra.gmra.mrb[8].mxu0 %v7722_v24  ;;  %v7741_v24 = vcombine.high %v7725_v57, %v7725_v57  ;;  %8301 = vst [vmem:[#allocation19_spill] sm:$0xff] %v7752_v16 }
  0xe2   :  { %2962 = vmatpush1.bf16.xpose.msra.mxu0 %v7084_v9  ;;  %2993 = vmatprep.mubr.bf16.mxu0 %v7725_v57  ;;  %v7098_v9 = vld [vmem:[#allocation5 + $0x1c4] ss:$36 sps:$4 sm:$0xff]  }
  0xe3   :  { %3001 = vmatprep.subr.bf16.mxu0 %v7092_v60  ;;  %8300 = vst [vmem:[#allocation18_spill] sm:$0xff] %v7741_v24  ;;  %v2857_v60 = vrot.slane %v2843_v12, %v7379_v43  ;;  %v7096_v12 = vld [vmem:[#allocation5 + $0x1c0] ss:$36 sps:$4 sm:$0xff]  }
  0xe7   :  { %6673 = vmatmul.mubr.bf16.vlgmr.msra.gmra.mrb[8].mxu1 %v7729_v22  ;;  %v7101_v22 = vld [vmem:[#allocation5 + $0x20c] ss:$36 sps:$4 sm:$0xff]  }
  0xe8   :  { %3282 = vmatpush1.bf16.xpose.msra.mxu1 %v7087_v7  ;;  %3313 = vmatprep.mubr.bf16.mxu1 %v7733_v32  ;;  %v3163_v7 = vcombine.high %v839_v47, %v839_v47 }
  0xe9   :  { %3321 = vmatprep.subr.bf16.mxu1 %v7095_v1  ;;  %2994 = vmatmul.mubr.bf16.vlgmr.msra.gmra.mrb[12].mxu0 %v7736_v6  ;;  %v2859_v1 = vcombine.high %v2857_v60, %v2857_v60 }
  0xea   :  { %3002 = vmatpush1.bf16.xpose.msra.mxu0 %v7090_v19  ;;  %3033 = vmatprep.mubr.bf16.mxu0 %v7741_v24  ;;  %v3177_v19 = vrot.slane %v3163_v7, %v7379_v43  ;;  %v7104_v24 = vld [vmem:[#allocation5 + $0x1cc] ss:$36 sps:$4 sm:$0xff]  }
  0xeb   :  { %3041 = vmatprep.subr.bf16.mxu0 %v7098_v9  ;;  %v7762_v9 = vrot.slane %v2859_v1, %v7379_v43  ;;  %v7776_v1 = vrot.slane %v2857_v60, %v7379_v43 }
  0xec   :  { %v3179_v47 = vcombine.high %v3177_v19, %v3177_v19 }
  0xed   :  { %8305 = vst [vmem:[#allocation23_spill] sm:$0xff] %v7776_v1 }
  0xee   :  { %v7771_v7 = vrot.slane %v3179_v47, %v7379_v43  ;;  %v7106_v47 = vld [vmem:[#allocation5 + $0x210] ss:$36 sps:$4 sm:$0xff]  }
  0xef   :  { %3314 = vmatmul.mubr.bf16.vlgmr.msra.gmra.mrb[12].mxu1 %v7746_v48 }
  0xf0   :  { %3322 = vmatpush1.bf16.xpose.msra.mxu1 %v7093_v11  ;;  %3353 = vmatprep.mubr.bf16.mxu1 %v7752_v16  ;;  %v7767_v11 = vcombine.high %v7746_v48, %v7746_v48  ;;  %8304 = vst [vmem:[#allocation22_spill] sm:$0xff] %v7771_v7  ;;  %v7108_v16 = vld [vmem:[#allocation5 + $0x214] ss:$36 sps:$4 sm:$0xff]   ;;  %v7790_v60 = vcombine.high %v7771_v7, %v7771_v7 }
  0xf1   :  { %3361 = vmatprep.subr.bf16.mxu1 %v7101_v22  ;;  %v7099_v22 = vld [vmem:[#allocation5 + $0x208] ss:$36 sps:$4 sm:$0xff]  }
  0xf2   :  { %8303 = vst [vmem:[#allocation21_spill] sm:$0xff] %v7767_v11  ;;  %8309 = vst [vmem:[#allocation26_spill] sm:$0xff] %v7790_v60 }
  0xf5   :  { %3034 = vmatmul.mubr.bf16.vlgmr.msra.gmra.mrb[12].mxu0 %v7759_v10  ;;  %v7780_v10 = vcombine.high %v7762_v9, %v7762_v9 }
  0xf6   :  { %3042 = vmatpush1.bf16.xpose.msra.mxu0 %v7096_v12  ;;  %3073 = vmatprep.mubr.bf16.mxu0 %v7762_v9  ;;  %v7102_v12 = vld [vmem:[#allocation5 + $0x1c8] ss:$36 sps:$4 sm:$0xff]  }
  0xf7   :  { %3081 = vmatprep.subr.bf16.mxu0 %v7104_v24  ;;  %8306 = vst [vmem:[#allocation24_spill] sm:$0xff] %v7780_v10  ;;  %v7784_v24 = vrot.slane %v3177_v19, %v7379_v43  ;;  %v7109_v19 = vld [vmem:[#allocation5 + $0x1d0] ss:$36 sps:$4 sm:$0xff]  }
  0xf9   :  { %8307 = vst [vmem:[#allocation25_spill] sm:$0xff] %v7784_v24 }
  0xfb   :  { %3354 = vmatmul.mubr.bf16.vlgmr.msra.gmra.mrb[12].mxu1 %v7767_v11 }
  0xfc   :  { %3362 = vmatpush1.bf16.xpose.msra.mxu1 %v7099_v22  ;;  %3393 = vmatprep.mubr.bf16.mxu1 %v7771_v7  ;;  %v8308_v22 = vmov 0.0   ;;  %v6513_v7 = vld.sshfl [vmem:[#allocation7 + $0x3e] sm:$0x1 pattern:$0x75316420] }
  0xfd   :  { %3401 = vmatprep.subr.bf16.mxu1 %v7108_v16  ;;  %v7797_v16 = vcombine.high %v7776_v1, %v7776_v1 }
  0xff   :  { %8310 = vst [vmem:[#allocation27_spill] sm:$0xff] %v7797_v16 }
 0x101   :  { %3074 = vmatmul.mubr.bf16.vlgmr.msra.gmra.mrb[12].mxu0 %v7776_v1  ;;  %v7119_v1 = vld [vmem:[#allocation5 + $0x24c] ss:$36 sps:$4 sm:$0xff]  }
 0x102   :  { %3082 = vmatpush1.bf16.xpose.msra.mxu0 %v7102_v12  ;;  %3113 = vmatprep.mubr.bf16.mxu0 %v7780_v10  ;;  %v7113_v12 = vld [vmem:[#allocation5 + $0x244] ss:$36 sps:$4 sm:$0xff]   ;;  %v7802_v10 = vcombine.high %v7784_v24, %v7784_v24 }
 0x103   :  { %6676 = vmatprep.subr.bf16.mxu0 %v8308_v22 }
 0x107   :  { %3394 = vmatmul.mubr.bf16.vlgmr.msra.gmra.mrb[12].mxu1 %v7784_v24  ;;  %v6523_v24 = vld.sshfl [vmem:[#allocation7 + $0x47] sm:$0x1 pattern:$0x75316420] }
 0x108   :  { %3402 = vmatpush1.bf16.xpose.msra.mxu1 %v7106_v47  ;;  %3433 = vmatprep.mubr.bf16.mxu1 %v7790_v60  ;;  %v7110_v47 = vld [vmem:[#allocation5 + $0x218] ss:$36 sps:$4 sm:$0xff]   ;;  %v7116_v60 = vld [vmem:[#allocation5 + $0x28c] ss:$36 sps:$4 sm:$0xff]   ;;  %v7814_v11 = vrot.slane %v6523_v24, %v7379_v43 }
 0x109   :  { %6682 = vmatprep.subr.bf16.mxu1 %v8308_v22  ;;  %v7128_v24 = vld [vmem:[#allocation5 + $0x29c] ss:$36 sps:$4 sm:$0xff]  }
 0x10d   :  { %3114 = vmatmul.mubr.bf16.vlgmr.msra.gmra.mrb[12].mxu0 %v7797_v16  ;;  %v7111_v16 = vld [vmem:[#allocation5 + $0x240] ss:$36 sps:$4 sm:$0xff]  }
 0x10e   :  { %6677 = vmatpush3.bf16.xpose.msra.mxu0 %v7109_v19  ;;  %6678 = vmatprep.mubr.msk.bf16.mxu0 %vm7303_vm0, %v8308_v22  ;;  %v7810_v19 = vrot.slane %v6513_v7, %v7379_v43  ;;  %v7125_v7 = vld [vmem:[#allocation5 + $0x254] ss:$36 sps:$4 sm:$0xff]  }
 0x10f   :  { %3996 = vmatprep.subr.bf16.mxu0 %v7113_v12  ;;  %v7114_v12 = vld [vmem:[#allocation5 + $0x288] ss:$36 sps:$4 sm:$0xff]   ;;  %v7120_v43 = vld [vmem:[#allocation5 + $0x290] ss:$36 sps:$4 sm:$0xff]  }
 0x113   :  { %3434 = vmatmul.mubr.bf16.vlgmr.msra.gmra.mrb[12].mxu1 %v7802_v10 }
 0x114   :  { %6683 = vmatpush3.bf16.xpose.msra.mxu1 %v7110_v47  ;;  %6684 = vmatprep.mubr.msk.bf16.mxu1 %vm7303_vm0, %v8308_v22  ;;  %v7122_v47 = vld [vmem:[#allocation5 + $0x294] ss:$36 sps:$4 sm:$0xff]  }
 0x115   :  { %4242 = vmatprep.subr.bf16.mxu1 %v7116_v60  ;;  %v7117_v60 = vld [vmem:[#allocation5 + $0x248] ss:$36 sps:$4 sm:$0xff]  }
 0x119   :  { %6679 = vmatmul.mubr.bf16.vlgmr.msra.gmra.mrb[12].mxu0 %v7810_v19 }
 0x11a   :  { %3997 = vmatpush1.bf16.xpose.msra.mxu0 %v7111_v16  ;;  %4028 = vmatprep.mubr.bf16.mxu0 %v7386_v50  ;;  %v7123_v50 = vld [vmem:[#allocation5 + $0x250] ss:$36 sps:$4 sm:$0xff]  }
 0x11b   :  { %4036 = vmatprep.subr.bf16.mxu0 %v7119_v1  ;;  %v7131_v1 = vld [vmem:[#allocation5 + $0x25c] ss:$36 sps:$4 sm:$0xff]  }
 0x11f   :  { %6685 = vmatmul.mubr.bf16.vlgmr.msra.gmra.mrb[12].mxu1 %v7814_v11 }
 0x120   :  { %4243 = vmatpush1.bf16.xpose.msra.mxu1 %v7114_v12  ;;  %4274 = vmatprep.mubr.bf16.mxu1 %v7405_v3  ;;  %v7134_v3 = vld [vmem:[#allocation5 + $0x2a4] ss:$36 sps:$4 sm:$0xff]  }
 0x121   :  { %4282 = vmatprep.subr.bf16.mxu1 %v7122_v47  ;;  %4029 = vmatmul.mubr.bf16.vlgmr.msra.gmra.mrb[16].mxu0 %v7383_v49  ;;  %v7126_v49 = vld [vmem:[#allocation5 + $0x298] ss:$36 sps:$4 sm:$0xff]  }
 0x122   :  { %4037 = vmatpush1.bf16.xpose.msra.mxu0 %v7117_v60  ;;  %4068 = vmatprep.mubr.bf16.mxu0 %v7392_v55  ;;  %v7129_v55 = vld [vmem:[#allocation5 + $0x258] ss:$36 sps:$4 sm:$0xff]  }
 0x123   :  { %4076 = vmatprep.subr.bf16.mxu0 %v7125_v7 }
 0x127   :  { %4275 = vmatmul.mubr.bf16.vlgmr.msra.gmra.mrb[16].mxu1 %v7397_v61  ;;  %v7132_v61 = vld [vmem:[#allocation5 + $0x2a0] ss:$36 sps:$4 sm:$0xff]  }
 0x128   :  { %4283 = vmatpush1.bf16.xpose.msra.mxu1 %v7120_v43  ;;  %4314 = vmatprep.mubr.bf16.mxu1 %v7414_v15  ;;  %v7135_v15 = vld [vmem:[#allocation5 + $0x260] ss:$36 sps:$4 sm:$0xff]   ;;  %v7137_v43 = vld [vmem:[#allocation5 + $0x2d0] ss:$36 sps:$4 sm:$0xff]  }
 0x129   :  { %4322 = vmatprep.subr.bf16.mxu1 %v7128_v24  ;;  %v7145_v24 = vld [vmem:[#allocation5 + $0x2dc] ss:$36 sps:$4 sm:$0xff]  }
 0x12d   :  { %4069 = vmatmul.mubr.bf16.vlgmr.msra.gmra.mrb[16].mxu0 %v7428_v29  ;;  %v7139_v29 = vld [vmem:[#allocation5 + $0x2d4] ss:$36 sps:$4 sm:$0xff]  }
 0x12e   :  { %4077 = vmatpush1.bf16.xpose.msra.mxu0 %v7123_v50  ;;  %4108 = vmatprep.mubr.bf16.mxu0 %v7433_v35  ;;  %v7140_v50 = vld [vmem:[#allocation5 + $0x318] ss:$36 sps:$4 sm:$0xff]  }
 0x12f   :  { %4116 = vmatprep.subr.bf16.mxu0 %v7131_v1  ;;  %v7148_v1 = vld [vmem:[#allocation5 + $0x324] ss:$36 sps:$4 sm:$0xff]  }
 0x133   :  { %4315 = vmatmul.mubr.bf16.vlgmr.msra.gmra.mrb[16].mxu1 %v7442_v46 }
 0x134   :  { %4323 = vmatpush1.bf16.xpose.msra.mxu1 %v7126_v49  ;;  %4354 = vmatprep.mubr.bf16.mxu1 %v7447_v51  ;;  %v7151_v49 = vld [vmem:[#allocation5 + $0x2e4] ss:$36 sps:$4 sm:$0xff]  }
 0x135   :  { %4362 = vmatprep.subr.bf16.mxu1 %v7134_v3  ;;  %v7154_v3 = vld [vmem:[#allocation5 + $0x32c] ss:$36 sps:$4 sm:$0xff]  }
 0x139   :  { %4109 = vmatmul.mubr.bf16.vlgmr.msra.gmra.mrb[16].mxu0 %v7453_v53 }
 0x13a   :  { %4117 = vmatpush1.bf16.xpose.msra.mxu0 %v7129_v55  ;;  %4148 = vmatprep.mubr.bf16.mxu0 %v7457_v56  ;;  %v7136_v56 = vld [vmem:[#allocation5 + $0x2a8] ss:$36 sps:$4 sm:$0xff]  }
 0x13b   :  { %6688 = vmatprep.subr.bf16.mxu0 %v8308_v22  ;;  %v7168_v55 = vld [vmem:[#allocation5 + $0x3ac] ss:$36 sps:$4 sm:$0xff]  }
 0x13f   :  { %4355 = vmatmul.mubr.bf16.vlgmr.msra.gmra.mrb[16].mxu1 %v7463_v63 }
 0x140   :  { %4363 = vmatpush1.bf16.xpose.msra.mxu1 %v7132_v61  ;;  %4394 = vmatprep.mubr.bf16.mxu1 %v7468_v2  ;;  %v7142_v2 = vld [vmem:[#allocation5 + $0x31c] ss:$36 sps:$4 sm:$0xff]  }
 0x141   :  { %6694 = vmatprep.subr.bf16.mxu1 %v8308_v22 }
 0x143   :  { %v7833_v35 = vpop.f32.mrb[0].mxu0 }
 0x144   :  { %v6644_v46 = vpop.f32.mrb[1].mxu0  ;;  %v3482_v63 = vsel %vm3481_vm1, %v7833_v35, 0.0 }
 0x145   :  { %4149 = vmatmul.mubr.bf16.vlgmr.msra.gmra.mrb[16].mxu0 %v7488_v31  ;;  %v1238_v51 = vpop.f32.mrb[2].mxu0 }
 0x146   :  { %6689 = vmatpush3.bf16.xpose.msra.mxu0 %v7135_v15  ;;  %6690 = vmatprep.mubr.msk.bf16.mxu0 %vm7303_vm0, %v8308_v22  ;;  %v6645_v53 = vpop.f32.mrb[3].mxu0 }
 0x147   :  { %4488 = vmatprep.subr.bf16.mxu0 %v7139_v29  ;;  %v7163_v53 = vld [vmem:[#allocation5 + $0x360] ss:$36 sps:$4 sm:$0xff]  }
 0x14a   :  { %v7840_v16 = vpop.f32.mrb[0].mxu1 }
 0x14b   :  { %v3483_v12 = vsel %vm3481_vm1, %v7840_v16, 0.0  ;;  %v6650_v47 = vpop.f32.mrb[1].mxu1  ;;  %4395 = vmatmul.mubr.bf16.vlgmr.msra.gmra.mrb[16].mxu1 %v7499_v45  ;;  %v7143_v45 = vld [vmem:[#allocation5 + $0x2d8] ss:$36 sps:$4 sm:$0xff]  }
 0x14c   :  { %v3484_v31 = vadd.f32 %v3483_v12, %v3482_v63  ;;  %v1558_v60 = vpop.f32.mrb[2].mxu1  ;;  %6695 = vmatpush3.bf16.xpose.msra.mxu1 %v7136_v56  ;;  %6696 = vmatprep.mubr.msk.bf16.mxu1 %vm7303_vm0, %v8308_v22  ;;  %v7171_v56 = vld [vmem:[#allocation5 + $0x36c] ss:$36 sps:$4 sm:$0xff]   ;;  %v7177_v12 = vld [vmem:[#allocation5 + $0x374] ss:$36 sps:$4 sm:$0xff]  }
 0x14d   :  { %v6651_v7 = vpop.f32.mrb[3].mxu1  ;;  %4734 = vmatprep.subr.bf16.mxu1 %v7142_v2  ;;  %v7166_v63 = vld [vmem:[#allocation5 + $0x3a8] ss:$36 sps:$4 sm:$0xff]   ;;  %v7174_v2 = vld [vmem:[#allocation5 + $0x3b4] ss:$36 sps:$4 sm:$0xff]  }
 0x14e   :  { %v7180_v47 = vld [vmem:[#allocation5 + $0x3bc] ss:$36 sps:$4 sm:$0xff]   ;;  %v8314_v7 = vld [vmem:[#allocation14_spill] sm:$0xff] }
 0x151   :  { %6691 = vmatmul.mubr.bf16.vlgmr.msra.gmra.mrb[16].mxu0 %v7515_v62  ;;  %v7146_v62 = vld [vmem:[#allocation5 + $0x320] ss:$36 sps:$4 sm:$0xff]  }
 0x152   :  { %4489 = vmatpush1.bf16.xpose.msra.mxu0 %v7137_v43  ;;  %4520 = vmatprep.mubr.bf16.mxu0 %v7518_v4  ;;  %v7149_v4 = vld [vmem:[#allocation5 + $0x2e0] ss:$36 sps:$4 sm:$0xff]  }
 0x153   :  { %4528 = vmatprep.subr.bf16.mxu0 %v7145_v24 }
 0x157   :  { %6697 = vmatmul.mubr.bf16.vlgmr.msra.gmra.mrb[16].mxu1 %v7528_v20  ;;  %v7157_v20 = vld [vmem:[#allocation5 + $0x2ec] ss:$36 sps:$4 sm:$0xff]  }
 0x158   :  { %4735 = vmatpush1.bf16.xpose.msra.mxu1 %v7140_v50  ;;  %4766 = vmatprep.mubr.bf16.mxu1 %v7532_v23  ;;  %v7152_v23 = vld [vmem:[#allocation5 + $0x328] ss:$36 sps:$4 sm:$0xff]  }
 0x159   :  { %4774 = vmatprep.subr.bf16.mxu1 %v7148_v1  ;;  %4521 = vmatmul.mubr.bf16.vlgmr.msra.gmra.mrb[20].mxu0 %v7540_v38  ;;  %v7160_v38 = vld [vmem:[#allocation5 + $0x334] ss:$36 sps:$4 sm:$0xff]   ;;  %v7188_v1 = vld [vmem:[#allocation5 + $0x3c8] ss:$36 sps:$4 sm:$0xff]  }
 0x15a   :  { %4529 = vmatpush1.bf16.xpose.msra.mxu0 %v7143_v45  ;;  %4560 = vmatprep.mubr.bf16.mxu0 %v7548_v44  ;;  %v7155_v44 = vld [vmem:[#allocation5 + $0x2e8] ss:$36 sps:$4 sm:$0xff]   ;;  %v7194_v45 = vld [vmem:[#allocation5 + $0x43c] ss:$36 sps:$4 sm:$0xff]  }
 0x15b   :  { %4568 = vmatprep.subr.bf16.mxu0 %v7151_v49 }
 0x15f   :  { %4767 = vmatmul.mubr.bf16.vlgmr.msra.gmra.mrb[20].mxu1 %v7559_v8  ;;  %v7158_v8 = vld [vmem:[#allocation5 + $0x330] ss:$36 sps:$4 sm:$0xff]  }
 0x160   :  { %4775 = vmatpush1.bf16.xpose.msra.mxu1 %v7146_v62  ;;  %4806 = vmatprep.mubr.bf16.mxu1 %v7566_v14  ;;  %v7161_v14 = vld [vmem:[#allocation5 + $0x2f0] ss:$36 sps:$4 sm:$0xff]  }
 0x161   :  { %4814 = vmatprep.subr.bf16.mxu1 %v7154_v3 }
 0x165   :  { %4561 = vmatmul.mubr.bf16.vlgmr.msra.gmra.mrb[20].mxu0 %v7577_v54  ;;  %v7165_v54 = vld [vmem:[#allocation5 + $0x364] ss:$36 sps:$4 sm:$0xff]  }
 0x166   :  { %4569 = vmatpush1.bf16.xpose.msra.mxu0 %v7149_v4  ;;  %4600 = vmatprep.mubr.bf16.mxu0 %v7580_v26  ;;  %v8315_v4 = vld [vmem:[#allocation15_spill] sm:$0xff] }
 0x167   :  { %4608 = vmatprep.subr.bf16.mxu0 %v7157_v20 }
 0x16b   :  { %4807 = vmatmul.mubr.bf16.vlgmr.msra.gmra.mrb[20].mxu1 %v7585_v28 }
 0x16c   :  { %4815 = vmatpush1.bf16.xpose.msra.mxu1 %v7152_v23  ;;  %4846 = vmatprep.mubr.bf16.mxu1 %v7589_v33 }
 0x16d   :  { %4854 = vmatprep.subr.bf16.mxu1 %v7160_v38 }
 0x171   :  { %4601 = vmatmul.mubr.bf16.vlgmr.msra.gmra.mrb[20].mxu0 %v7594_v37 }
 0x172   :  { %4609 = vmatpush1.bf16.xpose.msra.mxu0 %v7155_v44  ;;  %4640 = vmatprep.mubr.bf16.mxu0 %v7598_v39  ;;  %v7189_v44 = vld [vmem:[#allocation5 + $0x3f0] ss:$36 sps:$4 sm:$0xff]  }
 0x173   :  { %6700 = vmatprep.subr.bf16.mxu0 %v8308_v22 }
 0x177   :  { %4847 = vmatmul.mubr.bf16.vlgmr.msra.gmra.mrb[20].mxu1 %v7602_v42 }
 0x178   :  { %4855 = vmatpush1.bf16.xpose.msra.mxu1 %v7158_v8  ;;  %4886 = vmatprep.mubr.bf16.mxu1 %v7610_v52  ;;  %v7162_v52 = vld [vmem:[#allocation5 + $0x338] ss:$36 sps:$4 sm:$0xff]  }
 0x179   :  { %6706 = vmatprep.subr.bf16.mxu1 %v8308_v22  ;;  %v7197_v8 = vld [vmem:[#allocation5 + $0x3fc] ss:$36 sps:$4 sm:$0xff]  }
 0x17c   :  { %v7865_v26 = vpop.f32.mrb[4].mxu0 }
 0x17d   :  { %v3485_v28 = vsel %vm3481_vm1, %v7865_v26, 0.0  ;;  %v6656_v33 = vpop.f32.mrb[5].mxu0  ;;  %4641 = vmatmul.mubr.bf16.vlgmr.msra.gmra.mrb[20].mxu0 %v7617_v58 }
 0x17e   :  { %v3486_v37 = vadd.f32 %v3485_v28, %v3484_v31  ;;  %6701 = vmatpush3.bf16.xpose.msra.mxu0 %v7161_v14  ;;  %v1878_v39 = vpop.f32.mrb[6].mxu0  ;;  %6702 = vmatprep.mubr.msk.bf16.mxu0 %vm7303_vm0, %v8308_v22  ;;  %v7191_v31 = vld [vmem:[#allocation5 + $0x3f4] ss:$36 sps:$4 sm:$0xff]   ;;  %v7200_v28 = vld [vmem:[#allocation5 + $0x444] ss:$36 sps:$4 sm:$0xff]  }
 0x17f   :  { %v6657_v42 = vpop.f32.mrb[7].mxu0  ;;  %4980 = vmatprep.subr.bf16.mxu0 %v7165_v54  ;;  %v8316_v14 = vld [vmem:[#allocation16_spill] sm:$0xff]  ;;  %v8317_v33 = vld [vmem:[#allocation17_spill] sm:$0xff] }
 0x180   :  { %v7192_v54 = vld [vmem:[#allocation5 + $0x438] ss:$36 sps:$4 sm:$0xff]   ;;  %v7203_v39 = vld [vmem:[#allocation5 + $0x404] ss:$36 sps:$4 sm:$0xff]  }
 0x181   :  { %v8318_v42 = vld [vmem:[#allocation18_spill] sm:$0xff] }
 0x182   :  { %v7872_v61 = vpop.f32.mrb[4].mxu1 }
 0x183   :  { %v3487_v15 = vsel %vm3481_vm1, %v7872_v61, 0.0  ;;  %v6662_v29 = vpop.f32.mrb[5].mxu1  ;;  %4887 = vmatmul.mubr.bf16.vlgmr.msra.gmra.mrb[20].mxu1 %v7622_v5  ;;  %v7169_v5 = vld [vmem:[#allocation5 + $0x368] ss:$36 sps:$4 sm:$0xff]  }
 0x184   :  { %v3488_v46 = vadd.f32 %v3487_v15, %v3486_v37  ;;  %v2198_v58 = vpop.f32.mrb[6].mxu1  ;;  %6707 = vmatpush3.bf16.xpose.msra.mxu1 %v7162_v52  ;;  %6708 = vmatprep.mubr.msk.bf16.mxu1 %vm7303_vm0, %v8308_v22  ;;  %v7195_v37 = vld [vmem:[#allocation5 + $0x3f8] ss:$36 sps:$4 sm:$0xff]   ;;  %v7198_v52 = vld [vmem:[#allocation5 + $0x440] ss:$36 sps:$4 sm:$0xff]  }
 0x185   :  { %v6663_v51 = vpop.f32.mrb[7].mxu1  ;;  %5226 = vmatprep.subr.bf16.mxu1 %v7168_v55  ;;  %v7206_v55 = vld [vmem:[#allocation5 + $0x44c] ss:$36 sps:$4 sm:$0xff]   ;;  %v7201_v15 = vld [vmem:[#allocation5 + $0x400] ss:$36 sps:$4 sm:$0xff]  }
 0x186   :  { %v7209_v29 = vld [vmem:[#allocation5 + $0x40c] ss:$36 sps:$4 sm:$0xff]   ;;  %v8321_v58 = vld [vmem:[#allocation21_spill] sm:$0xff] }
 0x187   :  { %v8322_v51 = vld [vmem:[#allocation22_spill] sm:$0xff] }
 0x189   :  { %6703 = vmatmul.mubr.bf16.vlgmr.msra.gmra.mrb[20].mxu0 %v7632_v59  ;;  %v7172_v59 = vld [vmem:[#allocation5 + $0x3b0] ss:$36 sps:$4 sm:$0xff]  }
 0x18a   :  { %4981 = vmatpush1.bf16.xpose.msra.mxu0 %v7163_v53  ;;  %5012 = vmatprep.mubr.bf16.mxu0 %v7635_v18  ;;  %v7175_v18 = vld [vmem:[#allocation5 + $0x370] ss:$36 sps:$4 sm:$0xff]  }
 0x18b   :  { %5020 = vmatprep.subr.bf16.mxu0 %v7171_v56  ;;  %v8323_v53 = vld [vmem:[#allocation23_spill] sm:$0xff]  ;;  %v8324_v56 = vld [vmem:[#allocation24_spill] sm:$0xff] }
 0x18f   :  { %6709 = vmatmul.mubr.bf16.vlgmr.msra.gmra.mrb[20].mxu1 %v7639_v25  ;;  %v7183_v25 = vld [vmem:[#allocation5 + $0x37c] ss:$36 sps:$4 sm:$0xff]  }
 0x190   :  { %5227 = vmatpush1.bf16.xpose.msra.mxu1 %v7166_v63  ;;  %5258 = vmatprep.mubr.bf16.mxu1 %v7643_v30  ;;  %v7178_v30 = vld [vmem:[#allocation5 + $0x3b8] ss:$36 sps:$4 sm:$0xff]   ;;  %v7210_v63 = vld [vmem:[#allocation5 + $0x450] ss:$36 sps:$4 sm:$0xff]  }
 0x191   :  { %5266 = vmatprep.subr.bf16.mxu1 %v7174_v2  ;;  %5013 = vmatmul.mubr.bf16.vlgmr.msra.gmra.mrb[24].mxu0 %v7646_v36  ;;  %v7186_v36 = vld [vmem:[#allocation5 + $0x3c4] ss:$36 sps:$4 sm:$0xff]  }
 0x192   :  { %5021 = vmatpush1.bf16.xpose.msra.mxu0 %v7169_v5  ;;  %5052 = vmatprep.mubr.bf16.mxu0 %v7651_v41  ;;  %v7181_v41 = vld [vmem:[#allocation5 + $0x378] ss:$36 sps:$4 sm:$0xff]   ;;  %v8325_v2 = vld [vmem:[#allocation25_spill] sm:$0xff]  ;;  %v7213_v5 = vld [vmem:[#allocation5 + $0x410] ss:$36 sps:$4 sm:$0xff]  }
 0x193   :  { %5060 = vmatprep.subr.bf16.mxu0 %v7177_v12 }
 0x197   :  { %5259 = vmatmul.mubr.bf16.vlgmr.msra.gmra.mrb[24].mxu1 %v7656_v34  ;;  %v8311_v34 = vld [vmem:[#allocation11_spill] sm:$0xff] }
 0x198   :  { %5267 = vmatpush1.bf16.xpose.msra.mxu1 %v7172_v59  ;;  %5298 = vmatprep.mubr.bf16.mxu1 %v7662_v0  ;;  %v7184_v0 = vld [vmem:[#allocation5 + $0x3c0] ss:$36 sps:$4 sm:$0xff]  }
 0x199   :  { %5306 = vmatprep.subr.bf16.mxu1 %v7180_v47 }
 0x19d   :  { %5053 = vmatmul.mubr.bf16.vlgmr.msra.gmra.mrb[24].mxu0 %v7669_v13  ;;  %v8312_v13 = vld [vmem:[#allocation12_spill] sm:$0xff] }
 0x19e   :  { %5061 = vmatpush1.bf16.xpose.msra.mxu0 %v7175_v18  ;;  %5092 = vmatprep.mubr.bf16.mxu0 %v7672_v17  ;;  %v8313_v17 = vld [vmem:[#allocation13_spill] sm:$0xff]  ;;  %v8327_v18 = vld [vmem:[#allocation27_spill] sm:$0xff] }
 0x19f   :  { %5100 = vmatprep.subr.bf16.mxu0 %v7183_v25 }
 0x1a3   :  { %5299 = vmatmul.mubr.bf16.vlgmr.msra.gmra.mrb[24].mxu1 %v7677_v21  ;;  %v7187_v21 = vld [vmem:[#allocation5 + $0x380] ss:$36 sps:$4 sm:$0xff]  }
 0x1a4   :  { %5307 = vmatpush1.bf16.xpose.msra.mxu1 %v7178_v30  ;;  %5338 = vmatprep.mubr.bf16.mxu1 %v7681_v27 }
 0x1a5   :  { %5346 = vmatprep.subr.bf16.mxu1 %v7186_v36 }
 0x1a9   :  { %5093 = vmatmul.mubr.bf16.vlgmr.msra.gmra.mrb[24].mxu0 %v7686_v40 }
 0x1aa   :  { %5101 = vmatpush1.bf16.xpose.msra.mxu0 %v7181_v41  ;;  %5132 = vmatprep.mubr.bf16.mxu0 %v8311_v34  ;;  %v7214_v41 = vld [vmem:[#allocation5 + $0x458] ss:$36 sps:$4 sm:$0xff]  }
 0x1ab   :  { %6712 = vmatprep.subr.bf16.mxu0 %v8308_v22 }
 0x1af   :  { %5339 = vmatmul.mubr.bf16.vlgmr.msra.gmra.mrb[24].mxu1 %v8312_v13 }
 0x1b0   :  { %5347 = vmatpush1.bf16.xpose.msra.mxu1 %v7184_v0  ;;  %5378 = vmatprep.mubr.bf16.mxu1 %v8313_v17 }
 0x1b1   :  { %6718 = vmatprep.subr.bf16.mxu1 %v8308_v22 }
 0x1b4   :  { %v7897_v27 = vpop.f32.mrb[8].mxu0 }
 0x1b5   :  { %v3489_v40 = vsel %vm3481_vm1, %v7897_v27, 0.0  ;;  %v6668_v60 = vpop.f32.mrb[9].mxu0  ;;  %5133 = vmatmul.mubr.bf16.vlgmr.msra.gmra.mrb[24].mxu0 %v8314_v7 }
 0x1b6   :  { %v3490_v43 = vadd.f32 %v3489_v40, %v3488_v46  ;;  %6713 = vmatpush3.bf16.xpose.msra.mxu0 %v7187_v21  ;;  %v2518_v24 = vpop.f32.mrb[10].mxu0  ;;  %6714 = vmatprep.mubr.msk.bf16.mxu0 %vm7303_vm0, %v8308_v22  ;;  %v8320_v46 = vld [vmem:[#allocation20_spill] sm:$0xff] }
 0x1b7   :  { %v6669_v50 = vpop.f32.mrb[11].mxu0  ;;  %5472 = vmatprep.subr.bf16.mxu0 %v7191_v31 }
 0x1ba   :  { %v7904_v49 = vpop.f32.mrb[8].mxu1 }
 0x1bb   :  { %v3491_v62 = vsel %vm3481_vm1, %v7904_v49, 0.0  ;;  %v6674_v3 = vpop.f32.mrb[9].mxu1  ;;  %5379 = vmatmul.mubr.bf16.vlgmr.msra.gmra.mrb[24].mxu1 %v8315_v4 }
 0x1bc   :  { %v3492_v20 = vadd.f32 %v3491_v62, %v3490_v43  ;;  %v2838_v23 = vpop.f32.mrb[10].mxu1  ;;  %6719 = vmatpush3.bf16.xpose.msra.mxu1 %v7188_v1  ;;  %6720 = vmatprep.mubr.msk.bf16.mxu1 %vm7303_vm0, %v8308_v22 }
 0x1bd   :  { %v6675_v38 = vpop.f32.mrb[11].mxu1  ;;  %5718 = vmatprep.subr.bf16.mxu1 %v7194_v45 }
 0x1c1   :  { %6715 = vmatmul.mubr.bf16.vlgmr.msra.gmra.mrb[24].mxu0 %v8316_v14 }
 0x1c2   :  { %5473 = vmatpush1.bf16.xpose.msra.mxu0 %v7189_v44  ;;  %5504 = vmatprep.mubr.bf16.mxu0 %v7725_v57  ;;  %v8319_v57 = vld [vmem:[#allocation19_spill] sm:$0xff] }
 0x1c3   :  { %5512 = vmatprep.subr.bf16.mxu0 %v7197_v8 }
 0x1c7   :  { %6721 = vmatmul.mubr.bf16.vlgmr.msra.gmra.mrb[24].mxu1 %v8317_v33 }
 0x1c8   :  { %5719 = vmatpush1.bf16.xpose.msra.mxu1 %v7192_v54  ;;  %5750 = vmatprep.mubr.bf16.mxu1 %v7733_v32  ;;  %v7204_v32 = vld [vmem:[#allocation5 + $0x448] ss:$36 sps:$4 sm:$0xff]  }
 0x1c9   :  { %5758 = vmatprep.subr.bf16.mxu1 %v7200_v28  ;;  %5505 = vmatmul.mubr.bf16.vlgmr.msra.gmra.mrb[28].mxu0 %v7736_v6  ;;  %v7212_v6 = vld [vmem:[#allocation5 + $0x454] ss:$36 sps:$4 sm:$0xff]  }
 0x1ca   :  { %5513 = vmatpush1.bf16.xpose.msra.mxu0 %v7195_v37  ;;  %5544 = vmatprep.mubr.bf16.mxu0 %v8318_v42 }
 0x1cb   :  { %5552 = vmatprep.subr.bf16.mxu0 %v7203_v39 }
 0x1cf   :  { %5751 = vmatmul.mubr.bf16.vlgmr.msra.gmra.mrb[28].mxu1 %v7746_v48  ;;  %v7207_v48 = vld [vmem:[#allocation5 + $0x408] ss:$36 sps:$4 sm:$0xff]  }
 0x1d0   :  { %5759 = vmatpush1.bf16.xpose.msra.mxu1 %v7198_v52  ;;  %5790 = vmatprep.mubr.bf16.mxu1 %v8319_v57 }
 0x1d1   :  { %5798 = vmatprep.subr.bf16.mxu1 %v7206_v55 }
 0x1d5   :  { %5545 = vmatmul.mubr.bf16.vlgmr.msra.gmra.mrb[28].mxu0 %v8320_v46 }
 0x1d6   :  { %5553 = vmatpush1.bf16.xpose.msra.mxu0 %v7201_v15  ;;  %5584 = vmatprep.mubr.bf16.mxu0 %v7762_v9  ;;  %v8326_v9 = vld [vmem:[#allocation26_spill] sm:$0xff] }
 0x1d7   :  { %5592 = vmatprep.subr.bf16.mxu0 %v7209_v29 }
 0x1db   :  { %5791 = vmatmul.mubr.bf16.vlgmr.msra.gmra.mrb[28].mxu1 %v8321_v58 }
 0x1dc   :  { %5799 = vmatpush1.bf16.xpose.msra.mxu1 %v7204_v32  ;;  %5830 = vmatprep.mubr.bf16.mxu1 %v8322_v51 }
 0x1dd   :  { %5838 = vmatprep.subr.bf16.mxu1 %v7212_v6 }
 0x1e1   :  { %5585 = vmatmul.mubr.bf16.vlgmr.msra.gmra.mrb[28].mxu0 %v8323_v53 }
 0x1e2   :  { %5593 = vmatpush1.bf16.xpose.msra.mxu0 %v7207_v48  ;;  %5624 = vmatprep.mubr.bf16.mxu0 %v8324_v56 }
 0x1e3   :  { %6724 = vmatprep.subr.bf16.mxu0 %v8308_v22 }
 0x1e7   :  { %5831 = vmatmul.mubr.bf16.vlgmr.msra.gmra.mrb[28].mxu1 %v8325_v2 }
 0x1e8   :  { %5839 = vmatpush1.bf16.xpose.msra.mxu1 %v7210_v63  ;;  %5870 = vmatprep.mubr.bf16.mxu1 %v8326_v9 }
 0x1e9   :  { %6730 = vmatprep.subr.bf16.mxu1 %v8308_v22 }
 0x1ec   :  { %v7929_v12 = vpop.f32.mrb[12].mxu0 }
 0x1ed   :  { %v3493_v59 = vsel %vm3481_vm1, %v7929_v12, 0.0  ;;  %v6680_v47 = vpop.f32.mrb[13].mxu0  ;;  %5625 = vmatmul.mubr.bf16.vlgmr.msra.gmra.mrb[28].mxu0 %v8327_v18 }
 0x1ee   :  { %v3494_v25 = vadd.f32 %v3493_v59, %v3492_v20  ;;  %6725 = vmatpush3.bf16.xpose.msra.mxu0 %v7213_v5  ;;  %v3158_v30 = vpop.f32.mrb[14].mxu0  ;;  %6726 = vmatprep.mubr.msk.bf16.mxu0 %vm7303_vm0, %v8308_v22 }
 0x1ef   :  { %v6681_v36 = vpop.f32.mrb[15].mxu0 }
 0x1f2   :  { %v7936_v34 = vpop.f32.mrb[12].mxu1 }
 0x1f3   :  { %v3495_v0 = vsel %vm3481_vm1, %v7936_v34, 0.0  ;;  %v6686_v13 = vpop.f32.mrb[13].mxu1  ;;  %5871 = vmatmul.mubr.bf16.vlgmr.msra.gmra.mrb[28].mxu1 %v7802_v10 }
 0x1f4   :  { %v3496_v17 = vadd.f32 %v3495_v0, %v3494_v25  ;;  %v3478_v21 = vpop.f32.mrb[14].mxu1  ;;  %6731 = vmatpush3.bf16.xpose.msra.mxu1 %v7214_v41  ;;  %6732 = vmatprep.mubr.msk.bf16.mxu1 %vm7303_vm0, %v8308_v22 }
 0x1f5   :  { %v6687_v31 = vpop.f32.mrb[15].mxu1 }
 0x1f6   :  { %v3497_v40 = vmul.f32 0.125, %v3496_v17 }
 0x1f8   :  { %v3498_v60 = vmul.f32 %v3497_v40, %v3497_v40  ;;  %v3499_v43 = vand.u32 2147483647, %v3497_v40 }
 0x1f9   :  { %6727 = vmatmul.mubr.bf16.vlgmr.msra.gmra.mrb[28].mxu0 %v7810_v19 }
 0x1fa   :  { %v3501_v7 = vadd.f32 1.0, %v3498_v60  ;;  %v3500_v24 = vmul.f32 %v3499_v43, %v3497_v40 }
 0x1fc   :  { %7215 = vrcp.f32 %v3501_v7 }
 0x1ff   :  { %6733 = vmatmul.mubr.bf16.vlgmr.msra.gmra.mrb[28].mxu1 %v7814_v11 }
 0x206   :  { %v7216_v50 = vpop.eup %7215 }
 0x207   :  { %v3503_v1 = vmul.f32 %v7216_v50, %v3500_v24 }
 0x209   :  { %v3504_v10 = vmul.f32 %v3503_v1, %v7833_v35  ;;  %v3505_v45 = vmul.f32 %v3503_v1, %v7840_v16  ;;  %v3506_v62 = vmul.f32 %v3503_v1, %v7865_v26  ;;  %v3507_v22 = vmul.f32 %v3503_v1, %v7872_v61 }
 0x20a   :  { %v3508_v3 = vmul.f32 %v3503_v1, %v7897_v27  ;;  %v3509_v4 = vmul.f32 %v3503_v1, %v7904_v49  ;;  %v3510_v19 = vmul.f32 %v3503_v1, %v7929_v12  ;;  %v3511_v11 = vmul.f32 %v3503_v1, %v7936_v34 }
 0x20b   :  { %v3512_v20 = vsel %vm3481_vm1, %v3504_v10, 0.0  ;;  %v3515_v23 = vsel %vm3481_vm1, %v3505_v45, 0.0  ;;  %v3518_v38 = vsel %vm3481_vm1, %v3506_v62, 0.0  ;;  %v3521_v44 = vsel %vm3481_vm1, %v3507_v22, 0.0  ;;  %v8329_v62 = vld [vmem:[#allocation10_spill] sm:$0xff] }
 0x20c   :  { %3513 = vadd.xlane.f32.xlu0 %v3512_v20  ;;  %v3524_v8 = vsel %vm3481_vm1, %v3508_v3, 0.0  ;;  %v3527_v14 = vsel %vm3481_vm1, %v3509_v4, 0.0  ;;  %v3530_v54 = vsel %vm3481_vm1, %v3510_v19, 0.0  ;;  %v3533_v37 = vsel %vm3481_vm1, %v3511_v11, 0.0 }
 0x20d   :  { %v8328_v1 = vlaneseq }
 0x20f   :  { %v3545_v10 = vand.u32 127, %v8328_v1 }
 0x210   :  { %3516 = vadd.xlane.f32.xlu0 %v3515_v23 }
 0x211   :  { %v7987_v22 = vsub.s32 %v3545_v10, %v8329_v62 }
 0x214   :  { %3519 = vadd.xlane.f32.xlu0 %v3518_v38 }
 0x218   :  { %3522 = vadd.xlane.f32.xlu0 %v3521_v44 }
 0x21c   :  { %3525 = vadd.xlane.f32.xlu0 %v3524_v8 }
 0x220   :  { %3528 = vadd.xlane.f32.xlu0 %v3527_v14 }
 0x224   :  { %3531 = vadd.xlane.f32.xlu0 %v3530_v54  ;;  %v7960_v28 = vpop.f32.mrb[16].mxu0 }
 0x225   :  { %v6692_v33 = vpop.f32.mrb[17].mxu0  ;;  %v5918_v52 = vsel %vm3481_vm1, %v7960_v28, 0.0 }
 0x226   :  { %v4193_v39 = vpop.f32.mrb[18].mxu0 }
 0x227   :  { %v6693_v42 = vpop.f32.mrb[19].mxu0 }
 0x228   :  { %3534 = vadd.xlane.f32.xlu0 %v3533_v37 }
 0x22a   :  { %v7965_v55 = vpop.f32.mrb[16].mxu1 }
 0x22b   :  { %v5919_v57 = vsel %vm3481_vm1, %v7965_v55, 0.0  ;;  %v6698_v15 = vpop.f32.mrb[17].mxu1 }
 0x22c   :  { %v5920_v29 = vadd.f32 %v5919_v57, %v5918_v52  ;;  %v4439_v46 = vpop.f32.mrb[18].mxu1 }
 0x22d   :  { %v6699_v32 = vpop.f32.mrb[19].mxu1 }
 0x25c   :  { %v7969_v6 = vpop.f32.mrb[20].mxu0 }
 0x25d   :  { %v5921_v58 = vsel %vm3481_vm1, %v7969_v6, 0.0  ;;  %v6704_v51 = vpop.f32.mrb[21].mxu0 }
 0x25e   :  { %v5922_v48 = vadd.f32 %v5921_v58, %v5920_v29  ;;  %v4685_v53 = vpop.f32.mrb[22].mxu0 }
 0x25f   :  { %v6705_v56 = vpop.f32.mrb[23].mxu0 }
 0x262   :  { %v7973_v63 = vpop.f32.mrb[20].mxu1 }
 0x263   :  { %v5923_v2 = vsel %vm3481_vm1, %v7973_v63, 0.0  ;;  %v6710_v9 = vpop.f32.mrb[21].mxu1 }
 0x264   :  { %v5924_v5 = vadd.f32 %v5923_v2, %v5922_v48  ;;  %v4931_v59 = vpop.f32.mrb[22].mxu1 }
 0x265   :  { %v6711_v47 = vpop.f32.mrb[23].mxu1 }
 0x294   :  { %v7977_v18 = vpop.f32.mrb[24].mxu0 }
 0x295   :  { %v5925_v25 = vsel %vm3481_vm1, %v7977_v18, 0.0  ;;  %v6716_v30 = vpop.f32.mrb[25].mxu0 }
 0x296   :  { %v5926_v36 = vadd.f32 %v5925_v25, %v5924_v5  ;;  %v5177_v41 = vpop.f32.mrb[26].mxu0 }
 0x297   :  { %v6717_v0 = vpop.f32.mrb[27].mxu0 }
 0x299   :  { %v3514_v13 = vpop.xlane.xlu0 %3513 }
 0x29a   :  { %v7981_v17 = vpop.f32.mrb[24].mxu1  ;;  %v3549_v11 = vrot.slane %v3514_v13, %v7987_v22 }
 0x29b   :  { %v5927_v21 = vsel %vm3481_vm1, %v7981_v17, 0.0  ;;  %v6722_v31 = vpop.f32.mrb[25].mxu1 }
 0x29c   :  { %v5928_v40 = vadd.f32 %v5927_v21, %v5926_v36  ;;  %v5423_v60 = vpop.f32.mrb[26].mxu1 }
 0x29d   :  { %v6723_v7 = vpop.f32.mrb[27].mxu1  ;;  %v3517_v43 = vpop.xlane.xlu0 %3516 }
 0x29e   :  { %v3553_v4 = vrot.slane %v3517_v43, %v7987_v22 }
 0x2a0   :  { %v3579_v44 = vsel %vm3578_vm2, %v3553_v4, %v3549_v11 }
 0x2a1   :  { %v3520_v24 = vpop.xlane.xlu0 %3519 }
 0x2a2   :  { %v3557_v19 = vrot.slane %v3520_v24, %v7987_v22 }
 0x2a4   :  { %v3581_v14 = vsel %vm3580_vm3, %v3557_v19, %v3579_v44 }
 0x2a5   :  { %v3523_v50 = vpop.xlane.xlu0 %3522 }
 0x2a6   :  { %v3561_v20 = vrot.slane %v3523_v50, %v7987_v22 }
 0x2a8   :  { %v3583_v33 = vsel %vm3582_vm4, %v3561_v20, %v3581_v14 }
 0x2a9   :  { %v3526_v45 = vpop.xlane.xlu0 %3525 }
 0x2aa   :  { %v3565_v23 = vrot.slane %v3526_v45, %v7987_v22 }
 0x2ac   :  { %v3585_v37 = vsel %vm3584_vm5, %v3565_v23, %v3583_v33 }
 0x2ad   :  { %v3529_v3 = vpop.xlane.xlu0 %3528 }
 0x2ae   :  { %v3569_v8 = vrot.slane %v3529_v3, %v7987_v22 }
 0x2b0   :  { %v3587_v42 = vsel %vm3586_vm6, %v3569_v8, %v3585_v37 }
 0x2b1   :  { %v3532_v38 = vpop.xlane.xlu0 %3531 }
 0x2b2   :  { %v3573_v54 = vrot.slane %v3532_v38, %v7987_v22 }
 0x2b4   :  { %v3589_v57 = vsel %vm3588_vm7, %v3573_v54, %v3587_v42 }
 0x2b5   :  { %v3535_v39 = vpop.xlane.xlu0 %3534 }
 0x2b6   :  { %v3577_v52 = vrot.slane %v3535_v39, %v7987_v22 }
 0x2b8   :  { %v3591_v15 = vsel %vm3590_vm8, %v3577_v52, %v3589_v57 }
 0x2b9   :  { %v3594_v29 = vsel %vm3593_vm9, %v3591_v15, 0.0 }
 0x2ba   :  { %3595 = vadd.xlane.f32.xlu0 %v3594_v29 }
 0x2cc   :  { %v8005_v46 = vpop.f32.mrb[28].mxu0 }
 0x2cd   :  { %v5929_v32 = vsel %vm3481_vm1, %v8005_v46, 0.0  ;;  %v6728_v58 = vpop.f32.mrb[29].mxu0 }
 0x2ce   :  { %v5930_v51 = vadd.f32 %v5929_v32, %v5928_v40  ;;  %v5669_v48 = vpop.f32.mrb[30].mxu0 }
 0x2cf   :  { %v6729_v53 = vpop.f32.mrb[31].mxu0 }
 0x2d2   :  { %v8009_v56 = vpop.f32.mrb[28].mxu1 }
 0x2d3   :  { %v5931_v2 = vsel %vm3481_vm1, %v8009_v56, 0.0  ;;  %v6734_v9 = vpop.f32.mrb[29].mxu1 }
 0x2d4   :  { %v5932_v5 = vadd.f32 %v5931_v2, %v5930_v51  ;;  %v5915_v59 = vpop.f32.mrb[30].mxu1  ;;  %v8035_v2 = vsub.s32 0, %v8329_v62  ;;  %v8038_v9 = vsub.s32 1, %v8329_v62 }
 0x2d5   :  { %v6735_v47 = vpop.f32.mrb[31].mxu1 }
 0x2d6   :  { %v5933_v25 = vmul.f32 0.125, %v5932_v5  ;;  %v8041_v5 = vsub.s32 2, %v8329_v62  ;;  %v8044_v47 = vsub.s32 3, %v8329_v62 }
 0x2d8   :  { %v5934_v30 = vmul.f32 %v5933_v25, %v5933_v25  ;;  %v5935_v41 = vand.u32 2147483647, %v5933_v25 }
 0x2da   :  { %v5937_v36 = vadd.f32 1.0, %v5934_v30  ;;  %v5936_v0 = vmul.f32 %v5935_v41, %v5933_v25 }
 0x2dc   :  { %7217 = vrcp.f32 %v5937_v36  ;;  %v8047_v36 = vsub.s32 4, %v8329_v62 }
 0x2e6   :  { %v7218_v13 = vpop.eup %7217 }
 0x2e7   :  { %v5939_v21 = vmul.f32 %v7218_v13, %v5936_v0 }
 0x2e9   :  { %v5940_v31 = vmul.f32 %v5939_v21, %v7960_v28  ;;  %v5941_v40 = vmul.f32 %v5939_v21, %v7965_v55  ;;  %v5942_v60 = vmul.f32 %v5939_v21, %v7969_v6  ;;  %v5943_v7 = vmul.f32 %v5939_v21, %v7973_v63 }
 0x2ea   :  { %v5944_v43 = vmul.f32 %v5939_v21, %v7977_v18  ;;  %v5945_v24 = vmul.f32 %v5939_v21, %v7981_v17  ;;  %v5946_v50 = vmul.f32 %v5939_v21, %v8005_v46  ;;  %v5947_v1 = vmul.f32 %v5939_v21, %v8009_v56 }
 0x2eb   :  { %v5948_v10 = vsel %vm3481_vm1, %v5940_v31, 0.0  ;;  %v5951_v45 = vsel %vm3481_vm1, %v5941_v40, 0.0  ;;  %v5954_v3 = vsel %vm3481_vm1, %v5942_v60, 0.0  ;;  %v5957_v4 = vsel %vm3481_vm1, %v5943_v7, 0.0 }
 0x2ec   :  { %5949 = vadd.xlane.f32.xlu1 %v5948_v10  ;;  %v5960_v19 = vsel %vm3481_vm1, %v5944_v43, 0.0  ;;  %v5963_v11 = vsel %vm3481_vm1, %v5945_v24, 0.0  ;;  %v5966_v20 = vsel %vm3481_vm1, %v5946_v50, 0.0  ;;  %v5969_v23 = vsel %vm3481_vm1, %v5947_v1, 0.0 }
 0x2ed   :  { %v8054_v31 = vsub.s32 5, %v8329_v62  ;;  %v8060_v24 = vsub.s32 6, %v8329_v62 }
 0x2f0   :  { %5952 = vadd.xlane.f32.xlu1 %v5951_v45  ;;  %v8066_v45 = vsub.s32 7, %v8329_v62 }
 0x2f4   :  { %5955 = vadd.xlane.f32.xlu1 %v5954_v3 }
 0x2f8   :  { %5958 = vadd.xlane.f32.xlu1 %v5957_v4 }
 0x2fc   :  { %5961 = vadd.xlane.f32.xlu1 %v5960_v19 }
 0x300   :  { %5964 = vadd.xlane.f32.xlu1 %v5963_v11 }
 0x304   :  { %5967 = vadd.xlane.f32.xlu1 %v5966_v20 }
 0x308   :  { %5970 = vadd.xlane.f32.xlu1 %v5969_v23 }
 0x347   :  { %v3596_v38 = vpop.xlane.xlu0 %3595 }
 0x348   :  { %v8029_v44 = vmul.f32 0.5, %v3596_v38 }
 0x34a   :  { %v3599_v8 = vrot.slane %v8029_v44, 4 }
 0x34c   :  { %v3600_v14 = vmax.f32 %v8029_v44, %v3599_v8 }
 0x34e   :  { %v3601_v54 = vrot.slane %v3600_v14, 2 }
 0x350   :  { %v3602_v33 = vmax.f32 %v3600_v14, %v3601_v54 }
 0x352   :  { %v3603_v37 = vrot.slane %v3602_v33, 1 }
 0x354   :  { %v3604_v39 = vmax.f32 %v3602_v33, %v3603_v37 }
 0x356   :  { %v3605_v42 = vsub.f32 %v8029_v44, %v3604_v39 }
 0x358   :  { %v3606_v52 = vmul.f32 1.442695, %v3605_v42 }
 0x35a   :  { %7219 = vpow2.f32 %v3606_v52 }
 0x364   :  { %v7220_v57 = vpop.eup %7219 }
 0x365   :  { %v3608_v15 = vrot.slane %v7220_v57, 4 }
 0x367   :  { %v3609_v29 = vadd.f32 %v7220_v57, %v3608_v15 }
 0x369   :  { %v3610_v32 = vrot.slane %v3609_v29, 2 }
 0x36b   :  { %v3611_v58 = vadd.f32 %v3610_v32, %v3609_v29 }
 0x36d   :  { %v3612_v51 = vrot.slane %v3611_v58, 1 }
 0x36f   :  { %v3613_v48 = vadd.f32 %v3612_v51, %v3611_v58 }
 0x371   :  { %7221 = vrcp.f32 %v3613_v48 }
 0x379   :  { %v5950_v53 = vpop.xlane.xlu1 %5949 }
 0x37b   :  { %v7222_v59 = vpop.eup %7221 }
 0x37c   :  { %v3615_v25 = vmul.f32 %v7222_v59, %v7220_v57 }
 0x37d   :  { %v5953_v30 = vpop.xlane.xlu1 %5952 }
 0x37e   :  { %v3620_v41 = vrot.slane %v3615_v25, %v8035_v2  ;;  %v3624_v0 = vrot.slane %v3615_v25, %v8038_v9  ;;  %v3628_v13 = vrot.slane %v3615_v25, %v8041_v5  ;;  %v3632_v21 = vrot.slane %v3615_v25, %v8044_v47 }
 0x37f   :  { %v3636_v43 = vrot.slane %v3615_v25, %v8047_v36  ;;  %v3640_v10 = vrot.slane %v3615_v25, %v8054_v31  ;;  %v3644_v20 = vrot.slane %v3615_v25, %v8060_v24  ;;  %v3648_v14 = vrot.slane %v3615_v25, %v8066_v45 }
 0x380   :  { %v3657_v40 = vmul.f32 %v3620_v41, %v7833_v35  ;;  %v3658_v60 = vmul.f32 %v3624_v0, %v7840_v16  ;;  %v3659_v50 = vmul.f32 %v3628_v13, %v7865_v26  ;;  %v3660_v3 = vmul.f32 %v3632_v21, %v7872_v61 }
 0x381   :  { %v5956_v7 = vpop.xlane.xlu1 %5955  ;;  %v3661_v23 = vmul.f32 %v3636_v43, %v7897_v27  ;;  %v3662_v54 = vmul.f32 %v3640_v10, %v7904_v49  ;;  %v3663_v39 = vmul.f32 %v3644_v20, %v7929_v12  ;;  %v3664_v57 = vmul.f32 %v3648_v14, %v7936_v34 }
 0x382   :  { %v3665_v1 = vsel %vm3481_vm1, %v3657_v40, 0.0  ;;  %v3666_v4 = vsel %vm3481_vm1, %v3658_v60, 0.0  ;;  %v3668_v38 = vsel %vm3481_vm1, %v3659_v50, 0.0  ;;  %v3670_v62 = vsel %vm3481_vm1, %v3660_v3, 0.0 }
 0x383   :  { %v3667_v19 = vadd.f32 %v3666_v4, %v3665_v1  ;;  %v3672_v42 = vsel %vm3481_vm1, %v3661_v23, 0.0  ;;  %v3674_v15 = vsel %vm3481_vm1, %v3662_v54, 0.0  ;;  %v3676_v58 = vsel %vm3481_vm1, %v3663_v39, 0.0 }
 0x384   :  { %v5987_v51 = vrot.slane %v5953_v30, %v7987_v22  ;;  %v5991_v59 = vrot.slane %v5956_v7, %v7987_v22  ;;  %v3678_v25 = vsel %vm3481_vm1, %v3664_v57, 0.0  ;;  %v5983_v41 = vrot.slane %v5950_v53, %v7987_v22 }
 0x385   :  { %v5959_v11 = vpop.xlane.xlu1 %5958  ;;  %v3669_v8 = vadd.f32 %v3668_v38, %v3667_v19 }
 0x386   :  { %v5995_v0 = vrot.slane %v5959_v11, %v7987_v22  ;;  %v6012_v60 = vsel %vm3578_vm2, %v5987_v51, %v5983_v41 }
 0x387   :  { %v3671_v33 = vadd.f32 %v3670_v62, %v3669_v8  ;;  %v6013_v30 = vsel %vm3580_vm3, %v5991_v59, %v6012_v60 }
 0x388   :  { %v6014_v7 = vsel %vm3582_vm4, %v5995_v0, %v6013_v30 }
 0x389   :  { %v5962_v37 = vpop.xlane.xlu1 %5961  ;;  %v3673_v52 = vadd.f32 %v3672_v42, %v3671_v33 }
 0x38a   :  { %v5999_v21 = vrot.slane %v5962_v37, %v7987_v22 }
 0x38b   :  { %v3675_v29 = vadd.f32 %v3674_v15, %v3673_v52 }
 0x38c   :  { %v6015_v53 = vsel %vm3584_vm5, %v5999_v21, %v6014_v7 }
 0x38d   :  { %v5965_v32 = vpop.xlane.xlu1 %5964  ;;  %v3677_v48 = vadd.f32 %v3676_v58, %v3675_v29 }
 0x38e   :  { %v6003_v43 = vrot.slane %v5965_v32, %v7987_v22 }
 0x38f   :  { %v3679_v13 = vadd.f32 %v3678_v25, %v3677_v48 }
 0x390   :  { %v6016_v4 = vsel %vm3586_vm6, %v6003_v43, %v6015_v53 }
 0x391   :  { %v5968_v40 = vpop.xlane.xlu1 %5967  ;;  %v3680_v50 = vmul.f32 %v3679_v13, %v3679_v13  ;;  %v3681_v38 = vand.u32 2147483647, %v3679_v13 }
 0x392   :  { %v6007_v1 = vrot.slane %v5968_v40, %v7987_v22 }
 0x393   :  { %v3683_v10 = vadd.f32 1.0, %v3680_v50  ;;  %v3682_v8 = vmul.f32 %v3681_v38, %v3679_v13 }
 0x394   :  { %v6017_v11 = vsel %vm3588_vm7, %v6007_v1, %v6016_v4 }
 0x395   :  { %v5971_v3 = vpop.xlane.xlu1 %5970  ;;  %7223 = vrcp.f32 %v3683_v10 }
 0x396   :  { %v6011_v19 = vrot.slane %v5971_v3, %v7987_v22 }
 0x398   :  { %v6018_v20 = vsel %vm3590_vm8, %v6011_v19, %v6017_v11 }
 0x399   :  { %v6020_v23 = vsel %vm3593_vm9, %v6018_v20, 0.0 }
 0x39a   :  { %6021 = vadd.xlane.f32.xlu1 %v6020_v23 }
 0x39f   :  { %v7224_v14 = vpop.eup %7223 }
 0x3a0   :  { %v3685_v54 = vmul.f32 %v7224_v14, %v3682_v8 }
 0x3a2   :  { %v3686_v62 = vmul.f32 %v3685_v54, %v7833_v35  ;;  %v3687_v33 = vmul.f32 %v3685_v54, %v7840_v16  ;;  %v3688_v37 = vmul.f32 %v3685_v54, %v7865_v26  ;;  %v3689_v39 = vmul.f32 %v3685_v54, %v7872_v61 }
 0x3a3   :  { %v3690_v42 = vmul.f32 %v3685_v54, %v7897_v27  ;;  %v3691_v52 = vmul.f32 %v3685_v54, %v7904_v49  ;;  %v8105_v57 = vmul.f32 %v3685_v54, %v7929_v12  ;;  %v8108_v15 = vmul.f32 %v3685_v54, %v7936_v34 }
 0x3a4   :  { %v3694_v29 = vsel %vm3481_vm1, %v3686_v62, 0.0  ;;  %v3697_v32 = vsel %vm3481_vm1, %v3687_v33, 0.0  ;;  %v3700_v58 = vsel %vm3481_vm1, %v3688_v37, 0.0  ;;  %v3703_v51 = vsel %vm3481_vm1, %v3689_v39, 0.0 }
 0x3a5   :  { %3695 = vadd.xlane.f32.xlu0 %v3694_v29  ;;  %3698 = vadd.xlane.f32.xlu1 %v3697_v32  ;;  %v3706_v48 = vsel %vm3481_vm1, %v3690_v42, 0.0  ;;  %v3709_v59 = vsel %vm3481_vm1, %v3691_v52, 0.0 }
 0x3a9   :  { %3701 = vadd.xlane.f32.xlu0 %v3700_v58 }
 0x3ad   :  { %3704 = vadd.xlane.f32.xlu0 %v3703_v51 }
 0x3b1   :  { %3707 = vadd.xlane.f32.xlu0 %v3706_v48 }
 0x3b5   :  { %3710 = vadd.xlane.f32.xlu0 %v3709_v59 }
 0x427   :  { %v6022_v25 = vpop.xlane.xlu1 %6021 }
 0x428   :  { %v8116_v41 = vmul.f32 0.5, %v6022_v25 }
 0x42a   :  { %v6024_v0 = vrot.slane %v8116_v41, 4 }
 0x42c   :  { %v6025_v13 = vmax.f32 %v8116_v41, %v6024_v0 }
 0x42e   :  { %v6026_v21 = vrot.slane %v6025_v13, 2 }
 0x430   :  { %v6027_v40 = vmax.f32 %v6025_v13, %v6026_v21 }
 0x432   :  { %v6028_v60 = vrot.slane %v6027_v40, 1 }
 0x434   :  { %v6029_v43 = vmax.f32 %v6027_v40, %v6028_v60 }
 0x436   :  { %v6030_v50 = vsub.f32 %v8116_v41, %v6029_v43 }
 0x438   :  { %v6031_v30 = vmul.f32 1.442695, %v6030_v50 }
 0x43a   :  { %7225 = vpow2.f32 %v6031_v30 }
 0x444   :  { %v7226_v1 = vpop.eup %7225 }
 0x445   :  { %v6033_v7 = vrot.slane %v7226_v1, 4 }
 0x447   :  { %v6034_v10 = vadd.f32 %v7226_v1, %v6033_v7 }
 0x449   :  { %v6035_v53 = vrot.slane %v6034_v10, 2 }
 0x44b   :  { %v6036_v3 = vadd.f32 %v6035_v53, %v6034_v10 }
 0x44d   :  { %v6037_v4 = vrot.slane %v6036_v3, 1 }
 0x44f   :  { %v6038_v19 = vadd.f32 %v6037_v4, %v6036_v3 }
 0x451   :  { %7227 = vrcp.f32 %v6038_v19 }
 0x45b   :  { %v7228_v11 = vpop.eup %7227 }
 0x45c   :  { %v6040_v20 = vmul.f32 %v7228_v11, %v7226_v1 }
 0x45e   :  { %v6045_v23 = vrot.slane %v6040_v20, %v8035_v2  ;;  %v6049_v38 = vrot.slane %v6040_v20, %v8038_v9  ;;  %v6053_v8 = vrot.slane %v6040_v20, %v8041_v5  ;;  %v6057_v14 = vrot.slane %v6040_v20, %v8044_v47 }
 0x45f   :  { %v6061_v54 = vrot.slane %v6040_v20, %v8047_v36  ;;  %v6065_v39 = vrot.slane %v6040_v20, %v8054_v31  ;;  %v6069_v58 = vrot.slane %v6040_v20, %v8060_v24  ;;  %v6073_v25 = vrot.slane %v6040_v20, %v8066_v45 }
 0x460   :  { %v6082_v62 = vmul.f32 %v6045_v23, %v7960_v28  ;;  %v6083_v33 = vmul.f32 %v6049_v38, %v7965_v55  ;;  %v6084_v37 = vmul.f32 %v6053_v8, %v7969_v6  ;;  %v6085_v42 = vmul.f32 %v6057_v14, %v7973_v63 }
 0x461   :  { %v6086_v51 = vmul.f32 %v6061_v54, %v7977_v18  ;;  %v6087_v0 = vmul.f32 %v6065_v39, %v7981_v17  ;;  %v6088_v40 = vmul.f32 %v6069_v58, %v8005_v46  ;;  %v6089_v50 = vmul.f32 %v6073_v25, %v8009_v56 }
 0x462   :  { %v6090_v52 = vsel %vm3481_vm1, %v6082_v62, 0.0  ;;  %v6091_v29 = vsel %vm3481_vm1, %v6083_v33, 0.0  ;;  %v6093_v48 = vsel %vm3481_vm1, %v6084_v37, 0.0  ;;  %v6095_v13 = vsel %vm3481_vm1, %v6085_v42, 0.0 }
 0x463   :  { %v6092_v32 = vadd.f32 %v6091_v29, %v6090_v52  ;;  %v6097_v60 = vsel %vm3481_vm1, %v6086_v51, 0.0  ;;  %v6099_v30 = vsel %vm3481_vm1, %v6087_v0, 0.0  ;;  %v6101_v7 = vsel %vm3481_vm1, %v6088_v40, 0.0 }
 0x464   :  { %v6103_v53 = vsel %vm3481_vm1, %v6089_v50, 0.0  ;;  %v3712_v58 = vsel %vm3481_vm1, %v8105_v57, 0.0 }
 0x465   :  { %v6094_v59 = vadd.f32 %v6093_v48, %v6092_v32  ;;  %v3715_v48 = vsel %vm3481_vm1, %v8108_v15, 0.0 }
 0x467   :  { %v6096_v21 = vadd.f32 %v6095_v13, %v6094_v59  ;;  %v3696_v13 = vpop.xlane.xlu0 %3695 }
 0x469   :  { %v6098_v43 = vadd.f32 %v6097_v60, %v6096_v21 }
 0x46b   :  { %v6100_v1 = vadd.f32 %v6099_v30, %v6098_v43  ;;  %v3702_v21 = vpop.xlane.xlu0 %3701  ;;  %v3699_v43 = vpop.xlane.xlu1 %3698 }
 0x46d   :  { %v6102_v10 = vadd.f32 %v6101_v7, %v6100_v1  ;;  %v3729_v1 = vrot.slane %v3696_v13, %v7987_v22  ;;  %v3733_v7 = vrot.slane %v3699_v43, %v7987_v22 }
 0x46f   :  { %v6104_v3 = vadd.f32 %v6103_v53, %v6102_v10  ;;  %v3705_v40 = vpop.xlane.xlu0 %3704  ;;  %v3737_v10 = vrot.slane %v3702_v21, %v7987_v22 }
 0x470   :  { %v3741_v53 = vrot.slane %v3705_v40, %v7987_v22 }
 0x471   :  { %v6105_v4 = vmul.f32 %v6104_v3, %v6104_v3  ;;  %v6106_v11 = vand.u32 2147483647, %v6104_v3 }
 0x473   :  { %v6108_v19 = vadd.f32 1.0, %v6105_v4  ;;  %v6107_v20 = vmul.f32 %v6106_v11, %v6104_v3  ;;  %v3708_v60 = vpop.xlane.xlu0 %3707  ;;  %v3758_v11 = vsel %vm3578_vm2, %v3733_v7, %v3729_v1 }
 0x474   :  { %v3745_v3 = vrot.slane %v3708_v60, %v7987_v22 }
 0x475   :  { %7229 = vrcp.f32 %v6108_v19 }
 0x477   :  { %v3711_v15 = vpop.xlane.xlu0 %3710 }
 0x47f   :  { %v7230_v23 = vpop.eup %7229 }
 0x480   :  { %v6110_v38 = vmul.f32 %v7230_v23, %v6107_v20  ;;  %v3749_v20 = vrot.slane %v3711_v15, %v7987_v22  ;;  %v3759_v23 = vsel %vm3580_vm3, %v3737_v10, %v3758_v11 }
 0x482   :  { %v6112_v8 = vmul.f32 %v6110_v38, %v7965_v55  ;;  %v6111_v14 = vmul.f32 %v6110_v38, %v7960_v28  ;;  %v6113_v54 = vmul.f32 %v6110_v38, %v7969_v6  ;;  %v6114_v62 = vmul.f32 %v6110_v38, %v7973_v63 }
 0x483   :  { %v6115_v33 = vmul.f32 %v6110_v38, %v7977_v18  ;;  %v6116_v37 = vmul.f32 %v6110_v38, %v7981_v17  ;;  %v6117_v39 = vmul.f32 %v6110_v38, %v8005_v46  ;;  %v6118_v42 = vmul.f32 %v6110_v38, %v8009_v56 }
 0x484   :  { %v6122_v52 = vsel %vm3481_vm1, %v6112_v8, 0.0  ;;  %v6119_v29 = vsel %vm3481_vm1, %v6111_v14, 0.0  ;;  %v6125_v32 = vsel %vm3481_vm1, %v6113_v54, 0.0  ;;  %v6128_v51 = vsel %vm3481_vm1, %v6114_v62, 0.0 }
 0x485   :  { %6123 = vadd.xlane.f32.xlu1 %v6122_v52  ;;  %6120 = vadd.xlane.f32.xlu0 %v6119_v29  ;;  %v6131_v59 = vsel %vm3481_vm1, %v6115_v33, 0.0  ;;  %v6134_v25 = vsel %vm3481_vm1, %v6116_v37, 0.0  ;;  %v6137_v0 = vsel %vm3481_vm1, %v6117_v39, 0.0  ;;  %v6140_v57 = vsel %vm3481_vm1, %v6118_v42, 0.0 }
 0x486   :  { %v3760_v8 = vsel %vm3582_vm4, %v3741_v53, %v3759_v23 }
 0x487   :  { %v3761_v14 = vsel %vm3584_vm5, %v3745_v3, %v3760_v8 }
 0x488   :  { %v3762_v33 = vsel %vm3586_vm6, %v3749_v20, %v3761_v14 }
 0x489   :  { %6126 = vadd.xlane.f32.xlu1 %v6125_v32  ;;  %3713 = vadd.xlane.f32.xlu0 %v3712_v58 }
 0x48d   :  { %6129 = vadd.xlane.f32.xlu1 %v6128_v51  ;;  %3716 = vadd.xlane.f32.xlu0 %v3715_v48 }
 0x491   :  { %6132 = vadd.xlane.f32.xlu1 %v6131_v59 }
 0x495   :  { %6135 = vadd.xlane.f32.xlu1 %v6134_v25 }
 0x499   :  { %6138 = vadd.xlane.f32.xlu1 %v6137_v0 }
 0x49d   :  { %6141 = vadd.xlane.f32.xlu1 %v6140_v57 }
 0x512   :  { %v6121_v50 = vpop.xlane.xlu0 %6120  ;;  %v6124_v30 = vpop.xlane.xlu1 %6123 }
 0x513   :  { %v6154_v58 = vrot.slane %v6121_v50, %v7987_v22  ;;  %v6158_v51 = vrot.slane %v6124_v30, %v7987_v22 }
 0x515   :  { %v6183_v57 = vsel %vm3578_vm2, %v6158_v51, %v6154_v58 }
 0x516   :  { %v3714_v4 = vpop.xlane.xlu0 %3713  ;;  %v6127_v19 = vpop.xlane.xlu1 %6126 }
 0x517   :  { %v3753_v38 = vrot.slane %v3714_v4, %v7987_v22  ;;  %v6162_v48 = vrot.slane %v6127_v19, %v7987_v22 }
 0x519   :  { %v3763_v39 = vsel %vm3588_vm7, %v3753_v38, %v3762_v33  ;;  %v6184_v21 = vsel %vm3580_vm3, %v6162_v48, %v6183_v57 }
 0x51a   :  { %v3717_v54 = vpop.xlane.xlu0 %3716  ;;  %v6130_v62 = vpop.xlane.xlu1 %6129 }
 0x51b   :  { %v3757_v37 = vrot.slane %v3717_v54, %v7987_v22  ;;  %v6166_v59 = vrot.slane %v6130_v62, %v7987_v22 }
 0x51d   :  { %v3764_v42 = vsel %vm3590_vm8, %v3757_v37, %v3763_v39  ;;  %v6185_v60 = vsel %vm3582_vm4, %v6166_v59, %v6184_v21 }
 0x51e   :  { %v6133_v52 = vpop.xlane.xlu1 %6132  ;;  %v3766_v29 = vsel %vm3593_vm9, %v3764_v42, 0.0 }
 0x51f   :  { %3767 = vadd.xlane.f32.xlu0 %v3766_v29  ;;  %v6170_v25 = vrot.slane %v6133_v52, %v7987_v22 }
 0x521   :  { %v6186_v43 = vsel %vm3584_vm5, %v6170_v25, %v6185_v60 }
 0x522   :  { %v6136_v32 = vpop.xlane.xlu1 %6135 }
 0x523   :  { %v6174_v13 = vrot.slane %v6136_v32, %v7987_v22 }
 0x525   :  { %v6187_v50 = vsel %vm3586_vm6, %v6174_v13, %v6186_v43 }
 0x526   :  { %v6139_v0 = vpop.xlane.xlu1 %6138 }
 0x527   :  { %v6178_v40 = vrot.slane %v6139_v0, %v7987_v22 }
 0x529   :  { %v6188_v1 = vsel %vm3588_vm7, %v6178_v40, %v6187_v50 }
 0x52a   :  { %v6142_v15 = vpop.xlane.xlu1 %6141 }
 0x52b   :  { %v6182_v30 = vrot.slane %v6142_v15, %v7987_v22 }
 0x52d   :  { %v6189_v7 = vsel %vm3590_vm8, %v6182_v30, %v6188_v1 }
 0x52e   :  { %v6191_v10 = vsel %vm3593_vm9, %v6189_v7, 0.0 }
 0x52f   :  { %6192 = vadd.xlane.f32.xlu1 %v6191_v10 }
 0x5ac   :  { %v3768_v53 = vpop.xlane.xlu0 %3767 }
 0x5ad   :  { %v3769_v3 = vmul.f32 0.5, %v3768_v53 }
 0x5af   :  { %v3770_v4 = vadd.f32 %v3769_v3, %v8029_v44 }
 0x5b1   :  { %v3771_v19 = vrot.slane %v3770_v4, 4 }
 0x5b3   :  { %v3772_v11 = vmax.f32 %v3770_v4, %v3771_v19 }
 0x5b5   :  { %v3773_v20 = vrot.slane %v3772_v11, 2 }
 0x5b7   :  { %v3774_v23 = vmax.f32 %v3772_v11, %v3773_v20 }
 0x5b9   :  { %v3775_v38 = vrot.slane %v3774_v23, 1 }
 0x5bb   :  { %v3776_v8 = vmax.f32 %v3774_v23, %v3775_v38 }
 0x5bc   :  { %v6193_v14 = vpop.xlane.xlu1 %6192 }
 0x5bd   :  { %v3777_v54 = vsub.f32 %v3770_v4, %v3776_v8  ;;  %v6194_v22 = vmul.f32 0.5, %v6193_v14 }
 0x5bf   :  { %v3778_v62 = vmul.f32 1.442695, %v3777_v54  ;;  %v6195_v33 = vadd.f32 %v6194_v22, %v8116_v41 }
 0x5c1   :  { %7231 = vpow2.f32 %v3778_v62  ;;  %v6196_v37 = vrot.slane %v6195_v33, 4 }
 0x5c3   :  { %v6197_v39 = vmax.f32 %v6195_v33, %v6196_v37 }
 0x5c5   :  { %v6198_v42 = vrot.slane %v6197_v39, 2 }
 0x5c7   :  { %v6199_v52 = vmax.f32 %v6197_v39, %v6198_v42 }
 0x5c9   :  { %v6200_v29 = vrot.slane %v6199_v52, 1 }
 0x5cb   :  { %v7232_v32 = vpop.eup %7231  ;;  %v6201_v44 = vmax.f32 %v6199_v52, %v6200_v29 }
 0x5cc   :  { %v3780_v58 = vrot.slane %v7232_v32, 4 }
 0x5cd   :  { %v6202_v51 = vsub.f32 %v6195_v33, %v6201_v44 }
 0x5ce   :  { %v3781_v48 = vadd.f32 %v7232_v32, %v3780_v58 }
 0x5cf   :  { %v6203_v59 = vmul.f32 1.442695, %v6202_v51 }
 0x5d0   :  { %v3782_v25 = vrot.slane %v3781_v48, 2 }
 0x5d1   :  { %7233 = vpow2.f32 %v6203_v59 }
 0x5d2   :  { %v3783_v0 = vadd.f32 %v3782_v25, %v3781_v48 }
 0x5d4   :  { %v3784_v57 = vrot.slane %v3783_v0, 1 }
 0x5d6   :  { %v3785_v13 = vadd.f32 %v3784_v57, %v3783_v0 }
 0x5d8   :  { %7235 = vrcp.f32 %v3785_v13 }
 0x5db   :  { %v7234_v21 = vpop.eup %7233 }
 0x5dc   :  { %v6205_v41 = vrot.slane %v7234_v21, 4 }
 0x5de   :  { %v6206_v40 = vadd.f32 %v7234_v21, %v6205_v41 }
 0x5e0   :  { %v6207_v60 = vrot.slane %v6206_v40, 2 }
 0x5e2   :  { %v7236_v43 = vpop.eup %7235  ;;  %v6208_v15 = vadd.f32 %v6207_v60, %v6206_v40 }
 0x5e3   :  { %v3787_v50 = vmul.f32 %v7236_v43, %v7232_v32 }
 0x5e4   :  { %v6209_v30 = vrot.slane %v6208_v15, 1 }
 0x5e5   :  { %v3792_v1 = vrot.slane %v3787_v50, %v8035_v2  ;;  %v3796_v7 = vrot.slane %v3787_v50, %v8038_v9  ;;  %v3800_v10 = vrot.slane %v3787_v50, %v8041_v5  ;;  %v3804_v53 = vrot.slane %v3787_v50, %v8044_v47 }
 0x5e6   :  { %v6210_v3 = vadd.f32 %v6209_v30, %v6208_v15  ;;  %v3808_v4 = vrot.slane %v3787_v50, %v8047_v36  ;;  %v3812_v23 = vrot.slane %v3787_v50, %v8054_v31  ;;  %v3816_v22 = vrot.slane %v3787_v50, %v8060_v24 }
 0x5e7   :  { %v3829_v19 = vmul.f32 %v3792_v1, %v7833_v35  ;;  %v3830_v11 = vmul.f32 %v3796_v7, %v7840_v16  ;;  %v3831_v20 = vmul.f32 %v3800_v10, %v7865_v26  ;;  %v3832_v38 = vmul.f32 %v3804_v53, %v7872_v61 }
 0x5e8   :  { %7237 = vrcp.f32 %v6210_v3  ;;  %v3833_v62 = vmul.f32 %v3808_v4, %v7897_v27  ;;  %v3820_v16 = vrot.slane %v3787_v50, %v8066_v45  ;;  %v3834_v26 = vmul.f32 %v3812_v23, %v7904_v49 }
 0x5e9   :  { %v3837_v8 = vsel %vm3481_vm1, %v3829_v19, 0.0  ;;  %v3838_v14 = vsel %vm3481_vm1, %v3830_v11, 0.0  ;;  %v3840_v35 = vsel %vm3481_vm1, %v3831_v20, 0.0  ;;  %v3842_v37 = vsel %vm3481_vm1, %v3832_v38, 0.0 }
 0x5ea   :  { %v3839_v54 = vadd.f32 %v3838_v14, %v3837_v8  ;;  %v3835_v61 = vmul.f32 %v3816_v22, %v7929_v12  ;;  %v3844_v42 = vsel %vm3481_vm1, %v3833_v62, 0.0  ;;  %v3836_v29 = vmul.f32 %v3820_v16, %v7936_v34  ;;  %v6607_v62 = vld [vmem:[%s8265_s1 + $0x1] ss:$0 sm:$0xff] }
 0x5eb   :  { %v3846_v32 = vsel %vm3481_vm1, %v3834_v26, 0.0 }
 0x5ec   :  { %v3841_v33 = vadd.f32 %v3840_v35, %v3839_v54  ;;  %v3848_v51 = vsel %vm3481_vm1, %v3835_v61, 0.0  ;;  %v3850_v49 = vsel %vm3481_vm1, %v3836_v29, 0.0  ;;  %v6305_v61 = vstv %s8266_s2 }
 0x5ee   :  { %v3843_v39 = vadd.f32 %v3842_v37, %v3841_v33 }
 0x5f0   :  { %v3845_v52 = vadd.f32 %v3844_v42, %v3843_v39 }
 0x5f2   :  { %v7238_v27 = vpop.eup %7237  ;;  %v3847_v44 = vadd.f32 %v3846_v32, %v3845_v52 }
 0x5f3   :  { %v6212_v58 = vmul.f32 %v7238_v27, %v7234_v21 }
 0x5f4   :  { %v3849_v48 = vadd.f32 %v3848_v51, %v3847_v44 }
 0x5f5   :  { %v6217_v59 = vrot.slane %v6212_v58, %v8035_v2  ;;  %v6221_v25 = vrot.slane %v6212_v58, %v8038_v9  ;;  %v6225_v12 = vrot.slane %v6212_v58, %v8041_v5  ;;  %v6229_v57 = vrot.slane %v6212_v58, %v8044_v47 }
 0x5f6   :  { %v3851_v0 = vadd.f32 %v3850_v49, %v3849_v48  ;;  %v6233_v21 = vrot.slane %v6212_v58, %v8047_v36  ;;  %v6237_v2 = vrot.slane %v6212_v58, %v8054_v31 }
 0x5f7   :  { %v6254_v34 = vmul.f32 %v6217_v59, %v7960_v28  ;;  %v6255_v13 = vmul.f32 %v6221_v25, %v7965_v55  ;;  %v6256_v40 = vmul.f32 %v6225_v12, %v7969_v6  ;;  %v6257_v9 = vmul.f32 %v6229_v57, %v7973_v63 }
 0x5f8   :  { %v3852_v41 = vmul.f32 %v3851_v0, %v3851_v0  ;;  %v6241_v28 = vrot.slane %v6212_v58, %v8060_v24  ;;  %v6258_v55 = vmul.f32 %v6233_v21, %v7977_v18  ;;  %v6245_v6 = vrot.slane %v6212_v58, %v8066_v45 }
 0x5f9   :  { %v6262_v60 = vsel %vm3481_vm1, %v6254_v34, 0.0  ;;  %v6263_v5 = vsel %vm3481_vm1, %v6255_v13, 0.0  ;;  %v6265_v47 = vsel %vm3481_vm1, %v6256_v40, 0.0  ;;  %v6259_v50 = vmul.f32 %v6237_v2, %v7981_v17  ;;  %v6533_v17 = vld [vmem:[%s8265_s1] ss:$0 sm:$0xff] }
 0x5fa   :  { %v3855_v43 = vadd.f32 1.0, %v3852_v41  ;;  %v6264_v15 = vadd.f32 %v6263_v5, %v6262_v60  ;;  %v6267_v30 = vsel %vm3481_vm1, %v6257_v9, 0.0  ;;  %v6260_v63 = vmul.f32 %v6241_v28, %v8005_v46 }
 0x5fb   :  { %v6269_v1 = vsel %vm3481_vm1, %v6258_v55, 0.0  ;;  %v3853_v7 = vand.u32 2147483647, %v3851_v0  ;;  %v6261_v24 = vmul.f32 %v6245_v6, %v8009_v56  ;;  %v6271_v18 = vsel %vm3481_vm1, %v6259_v50, 0.0 }
 0x5fc   :  { %7239 = vrcp.f32 %v3855_v43  ;;  %v6266_v36 = vadd.f32 %v6265_v47, %v6264_v15  ;;  %v6273_v3 = vsel %vm3481_vm1, %v6260_v63, 0.0 }
 0x5fd   :  { %v3854_v4 = vmul.f32 %v3853_v7, %v3851_v0  ;;  %v6275_v46 = vsel %vm3481_vm1, %v6261_v24, 0.0 }
 0x5fe   :  { %v6268_v31 = vadd.f32 %v6267_v30, %v6266_v36 }
 0x600   :  { %v6270_v10 = vadd.f32 %v6269_v1, %v6268_v31 }
 0x602   :  { %v6272_v53 = vadd.f32 %v6271_v18, %v6270_v10 }
 0x604   :  { %v6274_v45 = vadd.f32 %v6273_v3, %v6272_v53 }
 0x606   :  { %v7240_v19 = vpop.eup %7239  ;;  %v6276_v20 = vadd.f32 %v6275_v46, %v6274_v45 }
 0x607   :  { %v3857_v11 = vmul.f32 %v7240_v19, %v3854_v4 }
 0x608   :  { %v6277_v38 = vmul.f32 %v6276_v20, %v6276_v20  ;;  %v6278_v14 = vand.u32 2147483647, %v6276_v20 }
 0x609   :  { %v3865_v23 = vmul.f32 %v6533_v17, %v3857_v11 }
 0x60a   :  { %v6280_v8 = vadd.f32 1.0, %v6277_v38  ;;  %v6279_v54 = vmul.f32 %v6278_v14, %v6276_v20 }
 0x60b   :  { %v3866_v56 = vsel %vm3481_vm1, %v3865_v23, 0.0 }
 0x60c   :  { %3867 = vadd.xlane.f32.xlu0 %v3866_v56  ;;  %7241 = vrcp.f32 %v6280_v8 }
 0x616   :  { %v7242_v22 = vpop.eup %7241 }
 0x617   :  { %v6282_v35 = vmul.f32 %v7242_v22, %v6279_v54 }
 0x619   :  { %v6291_v33 = vmul.f32 %v6607_v62, %v6282_v35 }
 0x61b   :  { %v6292_v16 = vsel %vm3481_vm1, %v6291_v33, 0.0 }
 0x61c   :  { %6293 = vadd.xlane.f32.xlu1 %v6292_v16 }
 0x622   :  { %6297 = vrot.lane.b32.xlu0 %v6282_v35, %s7304_s23 }
 0x699   :  { %v3868_v26 = vpop.xlane.xlu0 %3867 }
 0x69d   :  { %v6298_v37 = vpop.permute.xlu0 %6297 }
 0x69e   :  { %v6301_v39 = vsel %vm6300_vm10, %v3857_v11, %v6298_v37 }
 0x69f   :  { %6303 = vst.msk [vmem:[%s8268_s4] sm:$0x3] %vm6302_vm11, %v6301_v39 }
 0x6a9   :  { %v6294_v42 = vpop.xlane.xlu1 %6293 }
 0x6aa   :  { %v6295_v52 = vadd.f32 %v6294_v42, %v3868_v26 }
 0x6ac   :  { %v6306_v29 = vadd.f32 %v6305_v61, %v6295_v52 }
 0x6ae   :  { %v6307_v32 = vsub.f32 0.0, %v6306_v29 }
 0x6b0   :  { %v6308_v27 = vmul.f32 1.442695, %v6307_v32 }
 0x6b2   :  { %7243 = vpow2.f32 %v6308_v27 }
 0x6bc   :  { %v7244_v44 = vpop.eup %7243 }
 0x6bd   :  { %v6310_v58 = vadd.f32 1.0, %v7244_v44 }
 0x6bf   :  { %7245 = vrcp.f32 %v6310_v58 }
 0x6c9   :  { %v7246_v51 = vpop.eup %7245 }
 0x6ca   :  { %6314 = vst.msk [vmem:[%s8269_s5] sm:$0x3] %vm6313_vm12, %v7246_v51 }
 0x6cb   :  { %6323 = vsyncpa [#allocation4], 1 }
 0x6cc   :  { %6324 = vsyncpa [#allocation6], 1 }

</bundles_post_ra>
